<compile_context>
chip_gen: v5e
topology: v5e:2x2
jax: 0.10.0
libtpu: 0.0.40
codegen_flags: <defaults>
</compile_context>

<pallas_src>
import math

import jax
import jax.numpy as jnp
from jax.experimental import pallas as pl
from jax.experimental.pallas import tpu as pltpu

LANE = 128                      # channel dims padded to a multiple of 128
ROW_ALIGN = 8                   # per-batch row stride alignment in flat slabs
MAX_BT = 32                     # max batch elements folded per grid step
VMEM_BUDGET = 24 * 1024 * 1024  # keep well under v7x's 64 MiB physical VMEM


def _layer_dims(size):
    """Reproduce ConvBottleneck.__init__: (in_d, out_d, kernel_size) per layer."""
    dims = []
    in_d = size
    first = True
    for i in range(3):
        out_d = int((in_d - 64) // 2 + 64)
        k = 9 if first else 8
        first = False
        if i == 2:
            out_d = 64
        dims.append((in_d, out_d, k))
        in_d = out_d
    return dims


def init_conv_bottleneck_params(key, size):
    """PyTorch-layout params: [(w (C_out, C_in, K), b (C_out,)), ...] with
    nn.Conv1d default init U(-1/sqrt(C_in*K), 1/sqrt(C_in*K))."""
    params = []
    for (in_d, out_d, k) in _layer_dims(size):
        key, kw, kb = jax.random.split(key, 3)
        bound = 1.0 / math.sqrt(in_d * k)
        w = jax.random.uniform(kw, (out_d, in_d, k), jnp.float32, -bound, bound)
        b = jax.random.uniform(kb, (out_d,), jnp.float32, -bound, bound)
        params.append((w, b))
    return params


def _round_up(n, m):
    return ((n + m - 1) // m) * m


def prepare_params(torch_params):
    """One-time repack (setup time, NOT per forward call):
    (C_out, C_in, K) -> (K, Cpad, Cpad) bf16 (MXU-native), bias -> (1, Cpad)
    f32.  Zero padding keeps padded channels exactly 0 through
    conv + bias + maxpool + relu, so results are unaffected."""
    cmax = max(max(w.shape[0], w.shape[1]) for (w, _) in torch_params)
    cpad = _round_up(cmax, LANE)
    layers = []
    for (w, b) in torch_params:
        c_out, c_in, k = w.shape
        w_kic = jnp.transpose(w, (2, 1, 0))                  # (K, C_in, C_out)
        w_pad = jnp.zeros((k, cpad, cpad), jnp.float32)
        w_pad = w_pad.at[:, :c_in, :c_out].set(w_kic).astype(jnp.bfloat16)
        b_pad = jnp.zeros((1, cpad), jnp.float32).at[0, :c_out].set(b)
        layers.append((w_pad, b_pad, int(k)))
    return {
        "layers": layers,
        "cpad": int(cpad),
        "c_in": int(torch_params[0][0].shape[1]),
        "c_out": int(torch_params[-1][0].shape[0]),
    }


def _geometry(l_in, ksizes):
    """Static per-layer lengths: input L, aligned row stride S, conv/pool lens."""
    Ls, Ss, l_convs, l_pools = [], [], [], []
    L = l_in
    for K in ksizes:
        lc = L - K + 1
        lp = lc // 2
        assert lp >= 1, "sequence too short for ConvBottleneck"
        Ls.append(L)
        Ss.append(_round_up(L, ROW_ALIGN))
        l_convs.append(lc)
        l_pools.append(lp)
        L = lp
    return Ls, Ss, l_convs, l_pools


def _pick_bt(batch, l_in, cpad, ksizes, Ss, l_convs, l_pools):
    """Largest batch tile that fits the VMEM budget; keep grid >= 2 when
    batch > 1 so the 'parallel' axis can shard across both TCs on v7x."""
    def vmem_usage(bt):
        use = 2 * bt * cpad * l_in * 4                 # input block, 2x buffered
        use += 2 * bt * l_pools[-1] * cpad * 4         # output block, 2x buffered
        use += 2 * sum(ksizes) * cpad * cpad * 2       # bf16 weights, 2x buffered
        for S, lc in zip(Ss, l_convs):
            use += bt * S * cpad * 4                   # f32 activation slab
            use += ((bt - 1) * S + lc) * cpad * 4      # f32 conv accumulator
        return use

    bt = min(batch, MAX_BT)
    while bt > 1 and vmem_usage(bt) > VMEM_BUDGET:
        bt -= 1
    if batch > 1 and -(-batch // bt) < 2:
        bt = max(1, -(-batch // 2))
    return bt


def conv_bottleneck_forward(x, prepared):
    """x: (B, size, L) float32 (PyTorch Conv1d layout) -> (B, 64, L_out)."""
    (w0, b0, k0), (w1, b1, k1), (w2, b2, k2) = prepared["layers"]
    cpad = prepared["cpad"]
    c_in = prepared["c_in"]
    c_out = prepared["c_out"]

    batch, c, l_in = x.shape
    assert c == c_in, (c, c_in)
    if c_in < cpad:  # no-op for TransVAE's size=128 (128 == cpad)
        x = jnp.pad(x, ((0, 0), (0, cpad - c_in), (0, 0)))

    ksizes = (k0, k1, k2)
    Ls, Ss, l_convs, l_pools = _geometry(l_in, ksizes)
    l_out = l_pools[-1]

    BT = _pick_bt(batch, l_in, cpad, ksizes, Ss, l_convs, l_pools)
    num_blocks = -(-batch // BT)
    padded_batch = num_blocks * BT
    if padded_batch != batch:  # rare: costs one extra HBM pass over x
        x = jnp.pad(x, ((0, padded_batch - batch), (0, 0), (0, 0)))

    # rows of the flat conv accumulator actually computed per layer
    Ms = [(BT - 1) * S + lc for S, lc in zip(Ss, l_convs)]

    def kernel(x_ref, w0_ref, b0_ref, w1_ref, b1_ref, w2_ref, b2_ref, o_ref,
               a0_ref, c0_ref, a1_ref, c1_ref, a2_ref, c2_ref):
        # ---- stage in: (BT, Cpad, L) channels-first tile -> flat channels-last
        # f32 slab (BT*S0, Cpad); one XLU transpose per batch element. ----
        for b in range(BT):
            a0_ref[pl.ds(b * Ss[0], Ls[0]), :] = jnp.transpose(x_ref[b], (1, 0))

        a_refs = (a0_ref, a1_ref, a2_ref)
        c_refs = (c0_ref, c1_ref, c2_ref)
        w_refs = (w0_ref, w1_ref, w2_ref)
        b_refs = (b0_ref, b1_ref, b2_ref)

        for li in range(3):
            a_ref, c_ref = a_refs[li], c_refs[li]
            w_ref = w_refs[li]
            S, K = Ss[li], ksizes[li]
            lp, M = l_pools[li], Ms[li]

            # Conv1d as K bf16 MXU matmuls over the whole flat slab: row
            # b*S + t of c_ref is conv_out[b, t] for t < l_conv.  Rows with
            # t >= l_conv (and alignment-gap rows) mix neighbouring batch
            # elements / stale data and are never read back.
            for k in range(K):
                tap = jnp.dot(a_ref[pl.ds(k, M), :].astype(jnp.bfloat16),
                              w_ref[k],
                              preferred_element_type=jnp.float32)
                if k == 0:
                    c_ref[...] = tap
                else:
                    c_ref[...] += tap

            # MaxPool1d(2) + bias + ReLU per batch element.  max/relu commute
            # with the per-channel bias, so bias is added to the pooled rows
            # only (l_pool rows instead of l_conv rows).
            bias = b_refs[li][...]                       # (1, Cpad) f32
            for b in range(BT):
                even = c_ref[pl.ds(b * S, lp, stride=2), :]       # rows 0,2,4,..
                odd = c_ref[pl.ds(b * S + 1, lp, stride=2), :]    # rows 1,3,5,..
                pooled = jnp.maximum(jnp.maximum(even, odd) + bias, 0.0)
                if li < 2:
                    a_refs[li + 1][pl.ds(b * Ss[li + 1], lp), :] = pooled
                else:
                    o_ref[b] = pooled.astype(o_ref.dtype)

    flops = 2 * num_blocks * sum(M * K * cpad * cpad
                                 for M, K in zip(Ms, ksizes))
    bytes_accessed = (4 * padded_batch * cpad * (l_in + l_out)
                      + 2 * sum(K * cpad * cpad for K in ksizes)
                      + 4 * 3 * cpad)

    scratch = []
    for S, M in zip(Ss, Ms):
        scratch.append(pltpu.VMEM((BT * S, cpad), jnp.float32))   # a_l slab
        scratch.append(pltpu.VMEM((M, cpad), jnp.float32))        # c_l conv acc

    out = pl.pallas_call(
        kernel,
        out_shape=jax.ShapeDtypeStruct((padded_batch, l_out, cpad), x.dtype),
        grid_spec=pltpu.PrefetchScalarGridSpec(
            num_scalar_prefetch=0,
            grid=(num_blocks,),
            in_specs=[
                pl.BlockSpec((BT, cpad, l_in), lambda i: (i, 0, 0)),
                pl.BlockSpec((k0, cpad, cpad), lambda i: (0, 0, 0)),
                pl.BlockSpec((1, cpad), lambda i: (0, 0)),
                pl.BlockSpec((k1, cpad, cpad), lambda i: (0, 0, 0)),
                pl.BlockSpec((1, cpad), lambda i: (0, 0)),
                pl.BlockSpec((k2, cpad, cpad), lambda i: (0, 0, 0)),
                pl.BlockSpec((1, cpad), lambda i: (0, 0)),
            ],
            out_specs=pl.BlockSpec((BT, l_out, cpad), lambda i: (i, 0, 0)),
            scratch_shapes=scratch,
        ),
        compiler_params=pltpu.CompilerParams(
            dimension_semantics=("parallel",),
            vmem_limit_bytes=32 * 1024 * 1024,
        ),
        cost_estimate=pl.CostEstimate(
            flops=flops, transcendentals=0, bytes_accessed=bytes_accessed),
    )(x, w0, b0, w1, b1, w2, b2)

    # Drop batch/channel padding; return PyTorch (B, C_out, L_out) layout.
    # (Kernel output stays lane-dense (..., 128); l_out is tiny, so this final
    # slice+transpose is negligible — keep channels-last in a larger model.)
    return jnp.transpose(out[:batch, :, :c_out], (0, 2, 1))


def ref_conv_bottleneck(x, torch_params):
    """Pure-JAX f32 reference of ConvBottleneck.forward."""
    h = x
    for (w, b) in torch_params:
        y = jax.lax.conv_general_dilated(
            h, w, window_strides=(1,), padding="VALID",
            dimension_numbers=("NCH", "OIH", "NCH"))
        y = y + b[None, :, None]
        lp = y.shape[-1] // 2
        y = y[..., :2 * lp].reshape(y.shape[0], y.shape[1], lp, 2).max(axis=-1)
        h = jax.nn.relu(y)
    return h


if __name__ == "__main__":
    # ConvBottleneck(size) requires in-channels == size (TransVAE d_model=128).
    # seq=64 survives all three conv+pool stages (64 -> 28 -> 10 -> 1).
    batch, size, seq = 2, 128, 64

    key = jax.random.PRNGKey(0)
    key, kx = jax.random.split(key)
    x = jax.random.normal(kx, (batch, size, seq), jnp.float32)

    torch_params = init_conv_bottleneck_params(key, size)   # PyTorch layout
    prepared = prepare_params(torch_params)                 # one-time repack

    out = conv_bottleneck_forward(x, prepared)
    out = jax.block_until_ready(out)

    ref = ref_conv_bottleneck(x, torch_params)
    assert out.shape == ref.shape, (out.shape, ref.shape)
    err = float(jnp.max(jnp.abs(out - ref)))
    # bf16 MXU matmuls (weights + activations) vs. f32 reference -> relaxed tol
    assert jnp.allclose(out, ref, atol=5e-2, rtol=5e-2), err

    print("KERNEL_OK")
</pallas_src>

<mosaic_0001>
module attributes {stable_mosaic.version = 11 : i64} {
  func.func @kernel(%arg0: i32, %arg1: memref<1x128x64xf32, #tpu.memory_space<vmem>>, %arg2: memref<9x128x128xbf16, #tpu.memory_space<vmem>>, %arg3: memref<1x128xf32, #tpu.memory_space<vmem>>, %arg4: memref<8x128x128xbf16, #tpu.memory_space<vmem>>, %arg5: memref<1x128xf32, #tpu.memory_space<vmem>>, %arg6: memref<8x128x128xbf16, #tpu.memory_space<vmem>>, %arg7: memref<1x128xf32, #tpu.memory_space<vmem>>, %arg8: memref<1x1x128xf32, #tpu.memory_space<vmem>>, %arg9: memref<64x128xf32, #tpu.memory_space<vmem>>, %arg10: memref<56x128xf32, #tpu.memory_space<vmem>>, %arg11: memref<32x128xf32, #tpu.memory_space<vmem>>, %arg12: memref<21x128xf32, #tpu.memory_space<vmem>>, %arg13: memref<16x128xf32, #tpu.memory_space<vmem>>, %arg14: memref<3x128xf32, #tpu.memory_space<vmem>>) attributes {dimension_semantics = [#tpu.dimension_semantics<parallel>], iteration_bounds = array<i64: 2>, scalar_prefetch = 0 : i64, scratch_operands = 6 : i64, tpu.core_type = #tpu.core_type<tc>, window_params = [{transform_indices = @transform_0, window_bounds = array<i64: 1, 128, 64>}, {pipeline_mode = #tpu.pipeline_mode<synchronous>, transform_indices = @transform_1, window_bounds = array<i64: 9, 128, 128>}, {pipeline_mode = #tpu.pipeline_mode<synchronous>, transform_indices = @transform_2, window_bounds = array<i64: 1, 128>}, {pipeline_mode = #tpu.pipeline_mode<synchronous>, transform_indices = @transform_3, window_bounds = array<i64: 8, 128, 128>}, {pipeline_mode = #tpu.pipeline_mode<synchronous>, transform_indices = @transform_4, window_bounds = array<i64: 1, 128>}, {pipeline_mode = #tpu.pipeline_mode<synchronous>, transform_indices = @transform_5, window_bounds = array<i64: 8, 128, 128>}, {pipeline_mode = #tpu.pipeline_mode<synchronous>, transform_indices = @transform_6, window_bounds = array<i64: 1, 128>}, {transform_indices = @transform_7, window_bounds = array<i64: 1, 1, 128>}]} {
    %c0 = arith.constant 0 : index
    %c0_0 = arith.constant 0 : index
    %c0_1 = arith.constant 0 : index
    %0 = vector.load %arg1[%c0, %c0_0, %c0_1] : memref<1x128x64xf32, #tpu.memory_space<vmem>>, vector<1x128x64xf32>
    %1 = vector.shape_cast %0 : vector<1x128x64xf32> to vector<128x64xf32>
    %2 = tpu.transpose %1, [1, 0] : vector<128x64xf32> -> vector<64x128xf32>
    %c0_2 = arith.constant 0 : index
    %c0_3 = arith.constant 0 : index
    %3 = vector.load %arg9[%c0_2, %c0_3] : memref<64x128xf32, #tpu.memory_space<vmem>>, vector<64x128xf32>
    tpu.vector_store %arg9[%c0_2, %c0_3], %2 {strides = array<i32>} : memref<64x128xf32, #tpu.memory_space<vmem>>, vector<64x128xf32>,
    %c0_4 = arith.constant 0 : index
    %c0_5 = arith.constant 0 : index
    %4 = vector.load %arg9[%c0_4, %c0_5] : memref<64x128xf32, #tpu.memory_space<vmem>>, vector<56x128xf32>
    %5 = arith.truncf %4 : vector<56x128xf32> to vector<56x128xbf16>
    %c0_6 = arith.constant 0 : index
    %c0_7 = arith.constant 0 : index
    %c0_8 = arith.constant 0 : index
    %6 = vector.load %arg2[%c0_6, %c0_7, %c0_8] : memref<9x128x128xbf16, #tpu.memory_space<vmem>>, vector<1x128x128xbf16>
    %7 = vector.shape_cast %6 : vector<1x128x128xbf16> to vector<128x128xbf16>
    %cst = arith.constant dense<0.000000e+00> : vector<56x128xf32>
    %8 = tpu.matmul %5, %7, %cst {dimension_numbers = #tpu.dot_dimension_numbers<[1], [0], [0], [1], [0, 0, 1, 1], [], []>} : vector<56x128xbf16>, vector<128x128xbf16>, vector<56x128xf32> -> vector<56x128xf32>
    %c0_9 = arith.constant 0 : index
    %c0_10 = arith.constant 0 : index
    %9 = vector.load %arg10[%c0_9, %c0_10] : memref<56x128xf32, #tpu.memory_space<vmem>>, vector<56x128xf32>
    tpu.vector_store %arg10[%c0_9, %c0_10], %8 {strides = array<i32>} : memref<56x128xf32, #tpu.memory_space<vmem>>, vector<56x128xf32>,
    %c1 = arith.constant 1 : index
    %c0_11 = arith.constant 0 : index
    %10 = vector.load %arg9[%c1, %c0_11] : memref<64x128xf32, #tpu.memory_space<vmem>>, vector<56x128xf32>
    %11 = arith.truncf %10 : vector<56x128xf32> to vector<56x128xbf16>
    %c1_12 = arith.constant 1 : index
    %c0_13 = arith.constant 0 : index
    %c0_14 = arith.constant 0 : index
    %12 = vector.load %arg2[%c1_12, %c0_13, %c0_14] : memref<9x128x128xbf16, #tpu.memory_space<vmem>>, vector<1x128x128xbf16>
    %13 = vector.shape_cast %12 : vector<1x128x128xbf16> to vector<128x128xbf16>
    %cst_15 = arith.constant dense<0.000000e+00> : vector<56x128xf32>
    %14 = tpu.matmul %11, %13, %cst_15 {dimension_numbers = #tpu.dot_dimension_numbers<[1], [0], [0], [1], [0, 0, 1, 1], [], []>} : vector<56x128xbf16>, vector<128x128xbf16>, vector<56x128xf32> -> vector<56x128xf32>
    %c0_16 = arith.constant 0 : index
    %c0_17 = arith.constant 0 : index
    %15 = vector.load %arg10[%c0_16, %c0_17] : memref<56x128xf32, #tpu.memory_space<vmem>>, vector<56x128xf32>
    %16 = arith.addf %15, %14 : vector<56x128xf32>
    %c0_18 = arith.constant 0 : index
    %c0_19 = arith.constant 0 : index
    %17 = vector.load %arg10[%c0_18, %c0_19] : memref<56x128xf32, #tpu.memory_space<vmem>>, vector<56x128xf32>
    tpu.vector_store %arg10[%c0_18, %c0_19], %16 {strides = array<i32>} : memref<56x128xf32, #tpu.memory_space<vmem>>, vector<56x128xf32>,
    %c2 = arith.constant 2 : index
    %c0_20 = arith.constant 0 : index
    %18 = vector.load %arg9[%c2, %c0_20] : memref<64x128xf32, #tpu.memory_space<vmem>>, vector<56x128xf32>
    %19 = arith.truncf %18 : vector<56x128xf32> to vector<56x128xbf16>
    %c2_21 = arith.constant 2 : index
    %c0_22 = arith.constant 0 : index
    %c0_23 = arith.constant 0 : index
    %20 = vector.load %arg2[%c2_21, %c0_22, %c0_23] : memref<9x128x128xbf16, #tpu.memory_space<vmem>>, vector<1x128x128xbf16>
    %21 = vector.shape_cast %20 : vector<1x128x128xbf16> to vector<128x128xbf16>
    %cst_24 = arith.constant dense<0.000000e+00> : vector<56x128xf32>
    %22 = tpu.matmul %19, %21, %cst_24 {dimension_numbers = #tpu.dot_dimension_numbers<[1], [0], [0], [1], [0, 0, 1, 1], [], []>} : vector<56x128xbf16>, vector<128x128xbf16>, vector<56x128xf32> -> vector<56x128xf32>
    %c0_25 = arith.constant 0 : index
    %c0_26 = arith.constant 0 : index
    %23 = vector.load %arg10[%c0_25, %c0_26] : memref<56x128xf32, #tpu.memory_space<vmem>>, vector<56x128xf32>
    %24 = arith.addf %23, %22 : vector<56x128xf32>
    %c0_27 = arith.constant 0 : index
    %c0_28 = arith.constant 0 : index
    %25 = vector.load %arg10[%c0_27, %c0_28] : memref<56x128xf32, #tpu.memory_space<vmem>>, vector<56x128xf32>
    tpu.vector_store %arg10[%c0_27, %c0_28], %24 {strides = array<i32>} : memref<56x128xf32, #tpu.memory_space<vmem>>, vector<56x128xf32>,
    %c3 = arith.constant 3 : index
    %c0_29 = arith.constant 0 : index
    %26 = vector.load %arg9[%c3, %c0_29] : memref<64x128xf32, #tpu.memory_space<vmem>>, vector<56x128xf32>
    %27 = arith.truncf %26 : vector<56x128xf32> to vector<56x128xbf16>
    %c3_30 = arith.constant 3 : index
    %c0_31 = arith.constant 0 : index
    %c0_32 = arith.constant 0 : index
    %28 = vector.load %arg2[%c3_30, %c0_31, %c0_32] : memref<9x128x128xbf16, #tpu.memory_space<vmem>>, vector<1x128x128xbf16>
    %29 = vector.shape_cast %28 : vector<1x128x128xbf16> to vector<128x128xbf16>
    %cst_33 = arith.constant dense<0.000000e+00> : vector<56x128xf32>
    %30 = tpu.matmul %27, %29, %cst_33 {dimension_numbers = #tpu.dot_dimension_numbers<[1], [0], [0], [1], [0, 0, 1, 1], [], []>} : vector<56x128xbf16>, vector<128x128xbf16>, vector<56x128xf32> -> vector<56x128xf32>
    %c0_34 = arith.constant 0 : index
    %c0_35 = arith.constant 0 : index
    %31 = vector.load %arg10[%c0_34, %c0_35] : memref<56x128xf32, #tpu.memory_space<vmem>>, vector<56x128xf32>
    %32 = arith.addf %31, %30 : vector<56x128xf32>
    %c0_36 = arith.constant 0 : index
    %c0_37 = arith.constant 0 : index
    %33 = vector.load %arg10[%c0_36, %c0_37] : memref<56x128xf32, #tpu.memory_space<vmem>>, vector<56x128xf32>
    tpu.vector_store %arg10[%c0_36, %c0_37], %32 {strides = array<i32>} : memref<56x128xf32, #tpu.memory_space<vmem>>, vector<56x128xf32>,
    %c4 = arith.constant 4 : index
    %c0_38 = arith.constant 0 : index
    %34 = vector.load %arg9[%c4, %c0_38] : memref<64x128xf32, #tpu.memory_space<vmem>>, vector<56x128xf32>
    %35 = arith.truncf %34 : vector<56x128xf32> to vector<56x128xbf16>
    %c4_39 = arith.constant 4 : index
    %c0_40 = arith.constant 0 : index
    %c0_41 = arith.constant 0 : index
    %36 = vector.load %arg2[%c4_39, %c0_40, %c0_41] : memref<9x128x128xbf16, #tpu.memory_space<vmem>>, vector<1x128x128xbf16>
    %37 = vector.shape_cast %36 : vector<1x128x128xbf16> to vector<128x128xbf16>
    %cst_42 = arith.constant dense<0.000000e+00> : vector<56x128xf32>
    %38 = tpu.matmul %35, %37, %cst_42 {dimension_numbers = #tpu.dot_dimension_numbers<[1], [0], [0], [1], [0, 0, 1, 1], [], []>} : vector<56x128xbf16>, vector<128x128xbf16>, vector<56x128xf32> -> vector<56x128xf32>
    %c0_43 = arith.constant 0 : index
    %c0_44 = arith.constant 0 : index
    %39 = vector.load %arg10[%c0_43, %c0_44] : memref<56x128xf32, #tpu.memory_space<vmem>>, vector<56x128xf32>
    %40 = arith.addf %39, %38 : vector<56x128xf32>
    %c0_45 = arith.constant 0 : index
    %c0_46 = arith.constant 0 : index
    %41 = vector.load %arg10[%c0_45, %c0_46] : memref<56x128xf32, #tpu.memory_space<vmem>>, vector<56x128xf32>
    tpu.vector_store %arg10[%c0_45, %c0_46], %40 {strides = array<i32>} : memref<56x128xf32, #tpu.memory_space<vmem>>, vector<56x128xf32>,
    %c5 = arith.constant 5 : index
    %c0_47 = arith.constant 0 : index
    %42 = vector.load %arg9[%c5, %c0_47] : memref<64x128xf32, #tpu.memory_space<vmem>>, vector<56x128xf32>
    %43 = arith.truncf %42 : vector<56x128xf32> to vector<56x128xbf16>
    %c5_48 = arith.constant 5 : index
    %c0_49 = arith.constant 0 : index
    %c0_50 = arith.constant 0 : index
    %44 = vector.load %arg2[%c5_48, %c0_49, %c0_50] : memref<9x128x128xbf16, #tpu.memory_space<vmem>>, vector<1x128x128xbf16>
    %45 = vector.shape_cast %44 : vector<1x128x128xbf16> to vector<128x128xbf16>
    %cst_51 = arith.constant dense<0.000000e+00> : vector<56x128xf32>
    %46 = tpu.matmul %43, %45, %cst_51 {dimension_numbers = #tpu.dot_dimension_numbers<[1], [0], [0], [1], [0, 0, 1, 1], [], []>} : vector<56x128xbf16>, vector<128x128xbf16>, vector<56x128xf32> -> vector<56x128xf32>
    %c0_52 = arith.constant 0 : index
    %c0_53 = arith.constant 0 : index
    %47 = vector.load %arg10[%c0_52, %c0_53] : memref<56x128xf32, #tpu.memory_space<vmem>>, vector<56x128xf32>
    %48 = arith.addf %47, %46 : vector<56x128xf32>
    %c0_54 = arith.constant 0 : index
    %c0_55 = arith.constant 0 : index
    %49 = vector.load %arg10[%c0_54, %c0_55] : memref<56x128xf32, #tpu.memory_space<vmem>>, vector<56x128xf32>
    tpu.vector_store %arg10[%c0_54, %c0_55], %48 {strides = array<i32>} : memref<56x128xf32, #tpu.memory_space<vmem>>, vector<56x128xf32>,
    %c6 = arith.constant 6 : index
    %c0_56 = arith.constant 0 : index
    %50 = vector.load %arg9[%c6, %c0_56] : memref<64x128xf32, #tpu.memory_space<vmem>>, vector<56x128xf32>
    %51 = arith.truncf %50 : vector<56x128xf32> to vector<56x128xbf16>
    %c6_57 = arith.constant 6 : index
    %c0_58 = arith.constant 0 : index
    %c0_59 = arith.constant 0 : index
    %52 = vector.load %arg2[%c6_57, %c0_58, %c0_59] : memref<9x128x128xbf16, #tpu.memory_space<vmem>>, vector<1x128x128xbf16>
    %53 = vector.shape_cast %52 : vector<1x128x128xbf16> to vector<128x128xbf16>
    %cst_60 = arith.constant dense<0.000000e+00> : vector<56x128xf32>
    %54 = tpu.matmul %51, %53, %cst_60 {dimension_numbers = #tpu.dot_dimension_numbers<[1], [0], [0], [1], [0, 0, 1, 1], [], []>} : vector<56x128xbf16>, vector<128x128xbf16>, vector<56x128xf32> -> vector<56x128xf32>
    %c0_61 = arith.constant 0 : index
    %c0_62 = arith.constant 0 : index
    %55 = vector.load %arg10[%c0_61, %c0_62] : memref<56x128xf32, #tpu.memory_space<vmem>>, vector<56x128xf32>
    %56 = arith.addf %55, %54 : vector<56x128xf32>
    %c0_63 = arith.constant 0 : index
    %c0_64 = arith.constant 0 : index
    %57 = vector.load %arg10[%c0_63, %c0_64] : memref<56x128xf32, #tpu.memory_space<vmem>>, vector<56x128xf32>
    tpu.vector_store %arg10[%c0_63, %c0_64], %56 {strides = array<i32>} : memref<56x128xf32, #tpu.memory_space<vmem>>, vector<56x128xf32>,
    %c7 = arith.constant 7 : index
    %c0_65 = arith.constant 0 : index
    %58 = vector.load %arg9[%c7, %c0_65] : memref<64x128xf32, #tpu.memory_space<vmem>>, vector<56x128xf32>
    %59 = arith.truncf %58 : vector<56x128xf32> to vector<56x128xbf16>
    %c7_66 = arith.constant 7 : index
    %c0_67 = arith.constant 0 : index
    %c0_68 = arith.constant 0 : index
    %60 = vector.load %arg2[%c7_66, %c0_67, %c0_68] : memref<9x128x128xbf16, #tpu.memory_space<vmem>>, vector<1x128x128xbf16>
    %61 = vector.shape_cast %60 : vector<1x128x128xbf16> to vector<128x128xbf16>
    %cst_69 = arith.constant dense<0.000000e+00> : vector<56x128xf32>
    %62 = tpu.matmul %59, %61, %cst_69 {dimension_numbers = #tpu.dot_dimension_numbers<[1], [0], [0], [1], [0, 0, 1, 1], [], []>} : vector<56x128xbf16>, vector<128x128xbf16>, vector<56x128xf32> -> vector<56x128xf32>
    %c0_70 = arith.constant 0 : index
    %c0_71 = arith.constant 0 : index
    %63 = vector.load %arg10[%c0_70, %c0_71] : memref<56x128xf32, #tpu.memory_space<vmem>>, vector<56x128xf32>
    %64 = arith.addf %63, %62 : vector<56x128xf32>
    %c0_72 = arith.constant 0 : index
    %c0_73 = arith.constant 0 : index
    %65 = vector.load %arg10[%c0_72, %c0_73] : memref<56x128xf32, #tpu.memory_space<vmem>>, vector<56x128xf32>
    tpu.vector_store %arg10[%c0_72, %c0_73], %64 {strides = array<i32>} : memref<56x128xf32, #tpu.memory_space<vmem>>, vector<56x128xf32>,
    %c8 = arith.constant 8 : index
    %c0_74 = arith.constant 0 : index
    %66 = vector.load %arg9[%c8, %c0_74] : memref<64x128xf32, #tpu.memory_space<vmem>>, vector<56x128xf32>
    %67 = arith.truncf %66 : vector<56x128xf32> to vector<56x128xbf16>
    %c8_75 = arith.constant 8 : index
    %c0_76 = arith.constant 0 : index
    %c0_77 = arith.constant 0 : index
    %68 = vector.load %arg2[%c8_75, %c0_76, %c0_77] : memref<9x128x128xbf16, #tpu.memory_space<vmem>>, vector<1x128x128xbf16>
    %69 = vector.shape_cast %68 : vector<1x128x128xbf16> to vector<128x128xbf16>
    %cst_78 = arith.constant dense<0.000000e+00> : vector<56x128xf32>
    %70 = tpu.matmul %67, %69, %cst_78 {dimension_numbers = #tpu.dot_dimension_numbers<[1], [0], [0], [1], [0, 0, 1, 1], [], []>} : vector<56x128xbf16>, vector<128x128xbf16>, vector<56x128xf32> -> vector<56x128xf32>
    %c0_79 = arith.constant 0 : index
    %c0_80 = arith.constant 0 : index
    %71 = vector.load %arg10[%c0_79, %c0_80] : memref<56x128xf32, #tpu.memory_space<vmem>>, vector<56x128xf32>
    %72 = arith.addf %71, %70 : vector<56x128xf32>
    %c0_81 = arith.constant 0 : index
    %c0_82 = arith.constant 0 : index
    %73 = vector.load %arg10[%c0_81, %c0_82] : memref<56x128xf32, #tpu.memory_space<vmem>>, vector<56x128xf32>
    tpu.vector_store %arg10[%c0_81, %c0_82], %72 {strides = array<i32>} : memref<56x128xf32, #tpu.memory_space<vmem>>, vector<56x128xf32>,
    %c0_83 = arith.constant 0 : index
    %c0_84 = arith.constant 0 : index
    %74 = vector.load %arg3[%c0_83, %c0_84] : memref<1x128xf32, #tpu.memory_space<vmem>>, vector<1x128xf32>
    %c0_85 = arith.constant 0 : index
    %c0_86 = arith.constant 0 : index
    %75 = tpu.strided_load %arg10[%c0_85, %c0_86] {strides = array<i32: 2, 1>} : memref<56x128xf32, #tpu.memory_space<vmem>>, vector<28x128xf32>
    %c1_87 = arith.constant 1 : index
    %c0_88 = arith.constant 0 : index
    %76 = tpu.strided_load %arg10[%c1_87, %c0_88] {strides = array<i32: 2, 1>} : memref<56x128xf32, #tpu.memory_space<vmem>>, vector<28x128xf32>
    %77 = arith.maximumf %75, %76 : vector<28x128xf32>
    %78 = vector.broadcast %74 : vector<1x128xf32> to vector<28x128xf32>
    %79 = arith.addf %77, %78 : vector<28x128xf32>
    %cst_89 = arith.constant 0.000000e+00 : f32
    %80 = vector.broadcast %cst_89 : f32 to vector<28x128xf32>
    %81 = arith.maximumf %79, %80 : vector<28x128xf32>
    %c0_90 = arith.constant 0 : index
    %c0_91 = arith.constant 0 : index
    %82 = vector.load %arg11[%c0_90, %c0_91] : memref<32x128xf32, #tpu.memory_space<vmem>>, vector<28x128xf32>
    tpu.vector_store %arg11[%c0_90, %c0_91], %81 {strides = array<i32>} : memref<32x128xf32, #tpu.memory_space<vmem>>, vector<28x128xf32>,
    %c0_92 = arith.constant 0 : index
    %c0_93 = arith.constant 0 : index
    %83 = vector.load %arg11[%c0_92, %c0_93] : memref<32x128xf32, #tpu.memory_space<vmem>>, vector<21x128xf32>
    %84 = arith.truncf %83 : vector<21x128xf32> to vector<21x128xbf16>
    %c0_94 = arith.constant 0 : index
    %c0_95 = arith.constant 0 : index
    %c0_96 = arith.constant 0 : index
    %85 = vector.load %arg4[%c0_94, %c0_95, %c0_96] : memref<8x128x128xbf16, #tpu.memory_space<vmem>>, vector<1x128x128xbf16>
    %86 = vector.shape_cast %85 : vector<1x128x128xbf16> to vector<128x128xbf16>
    %cst_97 = arith.constant dense<0.000000e+00> : vector<21x128xf32>
    %87 = tpu.matmul %84, %86, %cst_97 {dimension_numbers = #tpu.dot_dimension_numbers<[1], [0], [0], [1], [0, 0, 1, 1], [], []>} : vector<21x128xbf16>, vector<128x128xbf16>, vector<21x128xf32> -> vector<21x128xf32>
    %c0_98 = arith.constant 0 : index
    %c0_99 = arith.constant 0 : index
    %88 = vector.load %arg12[%c0_98, %c0_99] : memref<21x128xf32, #tpu.memory_space<vmem>>, vector<21x128xf32>
    tpu.vector_store %arg12[%c0_98, %c0_99], %87 {strides = array<i32>} : memref<21x128xf32, #tpu.memory_space<vmem>>, vector<21x128xf32>,
    %c1_100 = arith.constant 1 : index
    %c0_101 = arith.constant 0 : index
    %89 = vector.load %arg11[%c1_100, %c0_101] : memref<32x128xf32, #tpu.memory_space<vmem>>, vector<21x128xf32>
    %90 = arith.truncf %89 : vector<21x128xf32> to vector<21x128xbf16>
    %c1_102 = arith.constant 1 : index
    %c0_103 = arith.constant 0 : index
    %c0_104 = arith.constant 0 : index
    %91 = vector.load %arg4[%c1_102, %c0_103, %c0_104] : memref<8x128x128xbf16, #tpu.memory_space<vmem>>, vector<1x128x128xbf16>
    %92 = vector.shape_cast %91 : vector<1x128x128xbf16> to vector<128x128xbf16>
    %cst_105 = arith.constant dense<0.000000e+00> : vector<21x128xf32>
    %93 = tpu.matmul %90, %92, %cst_105 {dimension_numbers = #tpu.dot_dimension_numbers<[1], [0], [0], [1], [0, 0, 1, 1], [], []>} : vector<21x128xbf16>, vector<128x128xbf16>, vector<21x128xf32> -> vector<21x128xf32>
    %c0_106 = arith.constant 0 : index
    %c0_107 = arith.constant 0 : index
    %94 = vector.load %arg12[%c0_106, %c0_107] : memref<21x128xf32, #tpu.memory_space<vmem>>, vector<21x128xf32>
    %95 = arith.addf %94, %93 : vector<21x128xf32>
    %c0_108 = arith.constant 0 : index
    %c0_109 = arith.constant 0 : index
    %96 = vector.load %arg12[%c0_108, %c0_109] : memref<21x128xf32, #tpu.memory_space<vmem>>, vector<21x128xf32>
    tpu.vector_store %arg12[%c0_108, %c0_109], %95 {strides = array<i32>} : memref<21x128xf32, #tpu.memory_space<vmem>>, vector<21x128xf32>,
    %c2_110 = arith.constant 2 : index
    %c0_111 = arith.constant 0 : index
    %97 = vector.load %arg11[%c2_110, %c0_111] : memref<32x128xf32, #tpu.memory_space<vmem>>, vector<21x128xf32>
    %98 = arith.truncf %97 : vector<21x128xf32> to vector<21x128xbf16>
    %c2_112 = arith.constant 2 : index
    %c0_113 = arith.constant 0 : index
    %c0_114 = arith.constant 0 : index
    %99 = vector.load %arg4[%c2_112, %c0_113, %c0_114] : memref<8x128x128xbf16, #tpu.memory_space<vmem>>, vector<1x128x128xbf16>
    %100 = vector.shape_cast %99 : vector<1x128x128xbf16> to vector<128x128xbf16>
    %cst_115 = arith.constant dense<0.000000e+00> : vector<21x128xf32>
    %101 = tpu.matmul %98, %100, %cst_115 {dimension_numbers = #tpu.dot_dimension_numbers<[1], [0], [0], [1], [0, 0, 1, 1], [], []>} : vector<21x128xbf16>, vector<128x128xbf16>, vector<21x128xf32> -> vector<21x128xf32>
    %c0_116 = arith.constant 0 : index
    %c0_117 = arith.constant 0 : index
    %102 = vector.load %arg12[%c0_116, %c0_117] : memref<21x128xf32, #tpu.memory_space<vmem>>, vector<21x128xf32>
    %103 = arith.addf %102, %101 : vector<21x128xf32>
    %c0_118 = arith.constant 0 : index
    %c0_119 = arith.constant 0 : index
    %104 = vector.load %arg12[%c0_118, %c0_119] : memref<21x128xf32, #tpu.memory_space<vmem>>, vector<21x128xf32>
    tpu.vector_store %arg12[%c0_118, %c0_119], %103 {strides = array<i32>} : memref<21x128xf32, #tpu.memory_space<vmem>>, vector<21x128xf32>,
    %c3_120 = arith.constant 3 : index
    %c0_121 = arith.constant 0 : index
    %105 = vector.load %arg11[%c3_120, %c0_121] : memref<32x128xf32, #tpu.memory_space<vmem>>, vector<21x128xf32>
    %106 = arith.truncf %105 : vector<21x128xf32> to vector<21x128xbf16>
    %c3_122 = arith.constant 3 : index
    %c0_123 = arith.constant 0 : index
    %c0_124 = arith.constant 0 : index
    %107 = vector.load %arg4[%c3_122, %c0_123, %c0_124] : memref<8x128x128xbf16, #tpu.memory_space<vmem>>, vector<1x128x128xbf16>
    %108 = vector.shape_cast %107 : vector<1x128x128xbf16> to vector<128x128xbf16>
    %cst_125 = arith.constant dense<0.000000e+00> : vector<21x128xf32>
    %109 = tpu.matmul %106, %108, %cst_125 {dimension_numbers = #tpu.dot_dimension_numbers<[1], [0], [0], [1], [0, 0, 1, 1], [], []>} : vector<21x128xbf16>, vector<128x128xbf16>, vector<21x128xf32> -> vector<21x128xf32>
    %c0_126 = arith.constant 0 : index
    %c0_127 = arith.constant 0 : index
    %110 = vector.load %arg12[%c0_126, %c0_127] : memref<21x128xf32, #tpu.memory_space<vmem>>, vector<21x128xf32>
    %111 = arith.addf %110, %109 : vector<21x128xf32>
    %c0_128 = arith.constant 0 : index
    %c0_129 = arith.constant 0 : index
    %112 = vector.load %arg12[%c0_128, %c0_129] : memref<21x128xf32, #tpu.memory_space<vmem>>, vector<21x128xf32>
    tpu.vector_store %arg12[%c0_128, %c0_129], %111 {strides = array<i32>} : memref<21x128xf32, #tpu.memory_space<vmem>>, vector<21x128xf32>,
    %c4_130 = arith.constant 4 : index
    %c0_131 = arith.constant 0 : index
    %113 = vector.load %arg11[%c4_130, %c0_131] : memref<32x128xf32, #tpu.memory_space<vmem>>, vector<21x128xf32>
    %114 = arith.truncf %113 : vector<21x128xf32> to vector<21x128xbf16>
    %c4_132 = arith.constant 4 : index
    %c0_133 = arith.constant 0 : index
    %c0_134 = arith.constant 0 : index
    %115 = vector.load %arg4[%c4_132, %c0_133, %c0_134] : memref<8x128x128xbf16, #tpu.memory_space<vmem>>, vector<1x128x128xbf16>
    %116 = vector.shape_cast %115 : vector<1x128x128xbf16> to vector<128x128xbf16>
    %cst_135 = arith.constant dense<0.000000e+00> : vector<21x128xf32>
    %117 = tpu.matmul %114, %116, %cst_135 {dimension_numbers = #tpu.dot_dimension_numbers<[1], [0], [0], [1], [0, 0, 1, 1], [], []>} : vector<21x128xbf16>, vector<128x128xbf16>, vector<21x128xf32> -> vector<21x128xf32>
    %c0_136 = arith.constant 0 : index
    %c0_137 = arith.constant 0 : index
    %118 = vector.load %arg12[%c0_136, %c0_137] : memref<21x128xf32, #tpu.memory_space<vmem>>, vector<21x128xf32>
    %119 = arith.addf %118, %117 : vector<21x128xf32>
    %c0_138 = arith.constant 0 : index
    %c0_139 = arith.constant 0 : index
    %120 = vector.load %arg12[%c0_138, %c0_139] : memref<21x128xf32, #tpu.memory_space<vmem>>, vector<21x128xf32>
    tpu.vector_store %arg12[%c0_138, %c0_139], %119 {strides = array<i32>} : memref<21x128xf32, #tpu.memory_space<vmem>>, vector<21x128xf32>,
    %c5_140 = arith.constant 5 : index
    %c0_141 = arith.constant 0 : index
    %121 = vector.load %arg11[%c5_140, %c0_141] : memref<32x128xf32, #tpu.memory_space<vmem>>, vector<21x128xf32>
    %122 = arith.truncf %121 : vector<21x128xf32> to vector<21x128xbf16>
    %c5_142 = arith.constant 5 : index
    %c0_143 = arith.constant 0 : index
    %c0_144 = arith.constant 0 : index
    %123 = vector.load %arg4[%c5_142, %c0_143, %c0_144] : memref<8x128x128xbf16, #tpu.memory_space<vmem>>, vector<1x128x128xbf16>
    %124 = vector.shape_cast %123 : vector<1x128x128xbf16> to vector<128x128xbf16>
    %cst_145 = arith.constant dense<0.000000e+00> : vector<21x128xf32>
    %125 = tpu.matmul %122, %124, %cst_145 {dimension_numbers = #tpu.dot_dimension_numbers<[1], [0], [0], [1], [0, 0, 1, 1], [], []>} : vector<21x128xbf16>, vector<128x128xbf16>, vector<21x128xf32> -> vector<21x128xf32>
    %c0_146 = arith.constant 0 : index
    %c0_147 = arith.constant 0 : index
    %126 = vector.load %arg12[%c0_146, %c0_147] : memref<21x128xf32, #tpu.memory_space<vmem>>, vector<21x128xf32>
    %127 = arith.addf %126, %125 : vector<21x128xf32>
    %c0_148 = arith.constant 0 : index
    %c0_149 = arith.constant 0 : index
    %128 = vector.load %arg12[%c0_148, %c0_149] : memref<21x128xf32, #tpu.memory_space<vmem>>, vector<21x128xf32>
    tpu.vector_store %arg12[%c0_148, %c0_149], %127 {strides = array<i32>} : memref<21x128xf32, #tpu.memory_space<vmem>>, vector<21x128xf32>,
    %c6_150 = arith.constant 6 : index
    %c0_151 = arith.constant 0 : index
    %129 = vector.load %arg11[%c6_150, %c0_151] : memref<32x128xf32, #tpu.memory_space<vmem>>, vector<21x128xf32>
    %130 = arith.truncf %129 : vector<21x128xf32> to vector<21x128xbf16>
    %c6_152 = arith.constant 6 : index
    %c0_153 = arith.constant 0 : index
    %c0_154 = arith.constant 0 : index
    %131 = vector.load %arg4[%c6_152, %c0_153, %c0_154] : memref<8x128x128xbf16, #tpu.memory_space<vmem>>, vector<1x128x128xbf16>
    %132 = vector.shape_cast %131 : vector<1x128x128xbf16> to vector<128x128xbf16>
    %cst_155 = arith.constant dense<0.000000e+00> : vector<21x128xf32>
    %133 = tpu.matmul %130, %132, %cst_155 {dimension_numbers = #tpu.dot_dimension_numbers<[1], [0], [0], [1], [0, 0, 1, 1], [], []>} : vector<21x128xbf16>, vector<128x128xbf16>, vector<21x128xf32> -> vector<21x128xf32>
    %c0_156 = arith.constant 0 : index
    %c0_157 = arith.constant 0 : index
    %134 = vector.load %arg12[%c0_156, %c0_157] : memref<21x128xf32, #tpu.memory_space<vmem>>, vector<21x128xf32>
    %135 = arith.addf %134, %133 : vector<21x128xf32>
    %c0_158 = arith.constant 0 : index
    %c0_159 = arith.constant 0 : index
    %136 = vector.load %arg12[%c0_158, %c0_159] : memref<21x128xf32, #tpu.memory_space<vmem>>, vector<21x128xf32>
    tpu.vector_store %arg12[%c0_158, %c0_159], %135 {strides = array<i32>} : memref<21x128xf32, #tpu.memory_space<vmem>>, vector<21x128xf32>,
    %c7_160 = arith.constant 7 : index
    %c0_161 = arith.constant 0 : index
    %137 = vector.load %arg11[%c7_160, %c0_161] : memref<32x128xf32, #tpu.memory_space<vmem>>, vector<21x128xf32>
    %138 = arith.truncf %137 : vector<21x128xf32> to vector<21x128xbf16>
    %c7_162 = arith.constant 7 : index
    %c0_163 = arith.constant 0 : index
    %c0_164 = arith.constant 0 : index
    %139 = vector.load %arg4[%c7_162, %c0_163, %c0_164] : memref<8x128x128xbf16, #tpu.memory_space<vmem>>, vector<1x128x128xbf16>
    %140 = vector.shape_cast %139 : vector<1x128x128xbf16> to vector<128x128xbf16>
    %cst_165 = arith.constant dense<0.000000e+00> : vector<21x128xf32>
    %141 = tpu.matmul %138, %140, %cst_165 {dimension_numbers = #tpu.dot_dimension_numbers<[1], [0], [0], [1], [0, 0, 1, 1], [], []>} : vector<21x128xbf16>, vector<128x128xbf16>, vector<21x128xf32> -> vector<21x128xf32>
    %c0_166 = arith.constant 0 : index
    %c0_167 = arith.constant 0 : index
    %142 = vector.load %arg12[%c0_166, %c0_167] : memref<21x128xf32, #tpu.memory_space<vmem>>, vector<21x128xf32>
    %143 = arith.addf %142, %141 : vector<21x128xf32>
    %c0_168 = arith.constant 0 : index
    %c0_169 = arith.constant 0 : index
    %144 = vector.load %arg12[%c0_168, %c0_169] : memref<21x128xf32, #tpu.memory_space<vmem>>, vector<21x128xf32>
    tpu.vector_store %arg12[%c0_168, %c0_169], %143 {strides = array<i32>} : memref<21x128xf32, #tpu.memory_space<vmem>>, vector<21x128xf32>,
    %c0_170 = arith.constant 0 : index
    %c0_171 = arith.constant 0 : index
    %145 = vector.load %arg5[%c0_170, %c0_171] : memref<1x128xf32, #tpu.memory_space<vmem>>, vector<1x128xf32>
    %c0_172 = arith.constant 0 : index
    %c0_173 = arith.constant 0 : index
    %146 = tpu.strided_load %arg12[%c0_172, %c0_173] {strides = array<i32: 2, 1>} : memref<21x128xf32, #tpu.memory_space<vmem>>, vector<10x128xf32>
    %c1_174 = arith.constant 1 : index
    %c0_175 = arith.constant 0 : index
    %147 = tpu.strided_load %arg12[%c1_174, %c0_175] {strides = array<i32: 2, 1>} : memref<21x128xf32, #tpu.memory_space<vmem>>, vector<10x128xf32>
    %148 = arith.maximumf %146, %147 : vector<10x128xf32>
    %149 = vector.broadcast %145 : vector<1x128xf32> to vector<10x128xf32>
    %150 = arith.addf %148, %149 : vector<10x128xf32>
    %cst_176 = arith.constant 0.000000e+00 : f32
    %151 = vector.broadcast %cst_176 : f32 to vector<10x128xf32>
    %152 = arith.maximumf %150, %151 : vector<10x128xf32>
    %c0_177 = arith.constant 0 : index
    %c0_178 = arith.constant 0 : index
    %153 = vector.load %arg13[%c0_177, %c0_178] : memref<16x128xf32, #tpu.memory_space<vmem>>, vector<10x128xf32>
    tpu.vector_store %arg13[%c0_177, %c0_178], %152 {strides = array<i32>} : memref<16x128xf32, #tpu.memory_space<vmem>>, vector<10x128xf32>,
    %c0_179 = arith.constant 0 : index
    %c0_180 = arith.constant 0 : index
    %154 = vector.load %arg13[%c0_179, %c0_180] : memref<16x128xf32, #tpu.memory_space<vmem>>, vector<3x128xf32>
    %155 = arith.truncf %154 : vector<3x128xf32> to vector<3x128xbf16>
    %c0_181 = arith.constant 0 : index
    %c0_182 = arith.constant 0 : index
    %c0_183 = arith.constant 0 : index
    %156 = vector.load %arg6[%c0_181, %c0_182, %c0_183] : memref<8x128x128xbf16, #tpu.memory_space<vmem>>, vector<1x128x128xbf16>
    %157 = vector.shape_cast %156 : vector<1x128x128xbf16> to vector<128x128xbf16>
    %cst_184 = arith.constant dense<0.000000e+00> : vector<3x128xf32>
    %158 = tpu.matmul %155, %157, %cst_184 {dimension_numbers = #tpu.dot_dimension_numbers<[1], [0], [0], [1], [0, 0, 1, 1], [], []>} : vector<3x128xbf16>, vector<128x128xbf16>, vector<3x128xf32> -> vector<3x128xf32>
    %c0_185 = arith.constant 0 : index
    %c0_186 = arith.constant 0 : index
    %159 = vector.load %arg14[%c0_185, %c0_186] : memref<3x128xf32, #tpu.memory_space<vmem>>, vector<3x128xf32>
    tpu.vector_store %arg14[%c0_185, %c0_186], %158 {strides = array<i32>} : memref<3x128xf32, #tpu.memory_space<vmem>>, vector<3x128xf32>,
    %c1_187 = arith.constant 1 : index
    %c0_188 = arith.constant 0 : index
    %160 = vector.load %arg13[%c1_187, %c0_188] : memref<16x128xf32, #tpu.memory_space<vmem>>, vector<3x128xf32>
    %161 = arith.truncf %160 : vector<3x128xf32> to vector<3x128xbf16>
    %c1_189 = arith.constant 1 : index
    %c0_190 = arith.constant 0 : index
    %c0_191 = arith.constant 0 : index
    %162 = vector.load %arg6[%c1_189, %c0_190, %c0_191] : memref<8x128x128xbf16, #tpu.memory_space<vmem>>, vector<1x128x128xbf16>
    %163 = vector.shape_cast %162 : vector<1x128x128xbf16> to vector<128x128xbf16>
    %cst_192 = arith.constant dense<0.000000e+00> : vector<3x128xf32>
    %164 = tpu.matmul %161, %163, %cst_192 {dimension_numbers = #tpu.dot_dimension_numbers<[1], [0], [0], [1], [0, 0, 1, 1], [], []>} : vector<3x128xbf16>, vector<128x128xbf16>, vector<3x128xf32> -> vector<3x128xf32>
    %c0_193 = arith.constant 0 : index
    %c0_194 = arith.constant 0 : index
    %165 = vector.load %arg14[%c0_193, %c0_194] : memref<3x128xf32, #tpu.memory_space<vmem>>, vector<3x128xf32>
    %166 = arith.addf %165, %164 : vector<3x128xf32>
    %c0_195 = arith.constant 0 : index
    %c0_196 = arith.constant 0 : index
    %167 = vector.load %arg14[%c0_195, %c0_196] : memref<3x128xf32, #tpu.memory_space<vmem>>, vector<3x128xf32>
    tpu.vector_store %arg14[%c0_195, %c0_196], %166 {strides = array<i32>} : memref<3x128xf32, #tpu.memory_space<vmem>>, vector<3x128xf32>,
    %c2_197 = arith.constant 2 : index
    %c0_198 = arith.constant 0 : index
    %168 = vector.load %arg13[%c2_197, %c0_198] : memref<16x128xf32, #tpu.memory_space<vmem>>, vector<3x128xf32>
    %169 = arith.truncf %168 : vector<3x128xf32> to vector<3x128xbf16>
    %c2_199 = arith.constant 2 : index
    %c0_200 = arith.constant 0 : index
    %c0_201 = arith.constant 0 : index
    %170 = vector.load %arg6[%c2_199, %c0_200, %c0_201] : memref<8x128x128xbf16, #tpu.memory_space<vmem>>, vector<1x128x128xbf16>
    %171 = vector.shape_cast %170 : vector<1x128x128xbf16> to vector<128x128xbf16>
    %cst_202 = arith.constant dense<0.000000e+00> : vector<3x128xf32>
    %172 = tpu.matmul %169, %171, %cst_202 {dimension_numbers = #tpu.dot_dimension_numbers<[1], [0], [0], [1], [0, 0, 1, 1], [], []>} : vector<3x128xbf16>, vector<128x128xbf16>, vector<3x128xf32> -> vector<3x128xf32>
    %c0_203 = arith.constant 0 : index
    %c0_204 = arith.constant 0 : index
    %173 = vector.load %arg14[%c0_203, %c0_204] : memref<3x128xf32, #tpu.memory_space<vmem>>, vector<3x128xf32>
    %174 = arith.addf %173, %172 : vector<3x128xf32>
    %c0_205 = arith.constant 0 : index
    %c0_206 = arith.constant 0 : index
    %175 = vector.load %arg14[%c0_205, %c0_206] : memref<3x128xf32, #tpu.memory_space<vmem>>, vector<3x128xf32>
    tpu.vector_store %arg14[%c0_205, %c0_206], %174 {strides = array<i32>} : memref<3x128xf32, #tpu.memory_space<vmem>>, vector<3x128xf32>,
    %c3_207 = arith.constant 3 : index
    %c0_208 = arith.constant 0 : index
    %176 = vector.load %arg13[%c3_207, %c0_208] : memref<16x128xf32, #tpu.memory_space<vmem>>, vector<3x128xf32>
    %177 = arith.truncf %176 : vector<3x128xf32> to vector<3x128xbf16>
    %c3_209 = arith.constant 3 : index
    %c0_210 = arith.constant 0 : index
    %c0_211 = arith.constant 0 : index
    %178 = vector.load %arg6[%c3_209, %c0_210, %c0_211] : memref<8x128x128xbf16, #tpu.memory_space<vmem>>, vector<1x128x128xbf16>
    %179 = vector.shape_cast %178 : vector<1x128x128xbf16> to vector<128x128xbf16>
    %cst_212 = arith.constant dense<0.000000e+00> : vector<3x128xf32>
    %180 = tpu.matmul %177, %179, %cst_212 {dimension_numbers = #tpu.dot_dimension_numbers<[1], [0], [0], [1], [0, 0, 1, 1], [], []>} : vector<3x128xbf16>, vector<128x128xbf16>, vector<3x128xf32> -> vector<3x128xf32>
    %c0_213 = arith.constant 0 : index
    %c0_214 = arith.constant 0 : index
    %181 = vector.load %arg14[%c0_213, %c0_214] : memref<3x128xf32, #tpu.memory_space<vmem>>, vector<3x128xf32>
    %182 = arith.addf %181, %180 : vector<3x128xf32>
    %c0_215 = arith.constant 0 : index
    %c0_216 = arith.constant 0 : index
    %183 = vector.load %arg14[%c0_215, %c0_216] : memref<3x128xf32, #tpu.memory_space<vmem>>, vector<3x128xf32>
    tpu.vector_store %arg14[%c0_215, %c0_216], %182 {strides = array<i32>} : memref<3x128xf32, #tpu.memory_space<vmem>>, vector<3x128xf32>,
    %c4_217 = arith.constant 4 : index
    %c0_218 = arith.constant 0 : index
    %184 = vector.load %arg13[%c4_217, %c0_218] : memref<16x128xf32, #tpu.memory_space<vmem>>, vector<3x128xf32>
    %185 = arith.truncf %184 : vector<3x128xf32> to vector<3x128xbf16>
    %c4_219 = arith.constant 4 : index
    %c0_220 = arith.constant 0 : index
    %c0_221 = arith.constant 0 : index
    %186 = vector.load %arg6[%c4_219, %c0_220, %c0_221] : memref<8x128x128xbf16, #tpu.memory_space<vmem>>, vector<1x128x128xbf16>
    %187 = vector.shape_cast %186 : vector<1x128x128xbf16> to vector<128x128xbf16>
    %cst_222 = arith.constant dense<0.000000e+00> : vector<3x128xf32>
    %188 = tpu.matmul %185, %187, %cst_222 {dimension_numbers = #tpu.dot_dimension_numbers<[1], [0], [0], [1], [0, 0, 1, 1], [], []>} : vector<3x128xbf16>, vector<128x128xbf16>, vector<3x128xf32> -> vector<3x128xf32>
    %c0_223 = arith.constant 0 : index
    %c0_224 = arith.constant 0 : index
    %189 = vector.load %arg14[%c0_223, %c0_224] : memref<3x128xf32, #tpu.memory_space<vmem>>, vector<3x128xf32>
    %190 = arith.addf %189, %188 : vector<3x128xf32>
    %c0_225 = arith.constant 0 : index
    %c0_226 = arith.constant 0 : index
    %191 = vector.load %arg14[%c0_225, %c0_226] : memref<3x128xf32, #tpu.memory_space<vmem>>, vector<3x128xf32>
    tpu.vector_store %arg14[%c0_225, %c0_226], %190 {strides = array<i32>} : memref<3x128xf32, #tpu.memory_space<vmem>>, vector<3x128xf32>,
    %c5_227 = arith.constant 5 : index
    %c0_228 = arith.constant 0 : index
    %192 = vector.load %arg13[%c5_227, %c0_228] : memref<16x128xf32, #tpu.memory_space<vmem>>, vector<3x128xf32>
    %193 = arith.truncf %192 : vector<3x128xf32> to vector<3x128xbf16>
    %c5_229 = arith.constant 5 : index
    %c0_230 = arith.constant 0 : index
    %c0_231 = arith.constant 0 : index
    %194 = vector.load %arg6[%c5_229, %c0_230, %c0_231] : memref<8x128x128xbf16, #tpu.memory_space<vmem>>, vector<1x128x128xbf16>
    %195 = vector.shape_cast %194 : vector<1x128x128xbf16> to vector<128x128xbf16>
    %cst_232 = arith.constant dense<0.000000e+00> : vector<3x128xf32>
    %196 = tpu.matmul %193, %195, %cst_232 {dimension_numbers = #tpu.dot_dimension_numbers<[1], [0], [0], [1], [0, 0, 1, 1], [], []>} : vector<3x128xbf16>, vector<128x128xbf16>, vector<3x128xf32> -> vector<3x128xf32>
    %c0_233 = arith.constant 0 : index
    %c0_234 = arith.constant 0 : index
    %197 = vector.load %arg14[%c0_233, %c0_234] : memref<3x128xf32, #tpu.memory_space<vmem>>, vector<3x128xf32>
    %198 = arith.addf %197, %196 : vector<3x128xf32>
    %c0_235 = arith.constant 0 : index
    %c0_236 = arith.constant 0 : index
    %199 = vector.load %arg14[%c0_235, %c0_236] : memref<3x128xf32, #tpu.memory_space<vmem>>, vector<3x128xf32>
    tpu.vector_store %arg14[%c0_235, %c0_236], %198 {strides = array<i32>} : memref<3x128xf32, #tpu.memory_space<vmem>>, vector<3x128xf32>,
    %c6_237 = arith.constant 6 : index
    %c0_238 = arith.constant 0 : index
    %200 = vector.load %arg13[%c6_237, %c0_238] : memref<16x128xf32, #tpu.memory_space<vmem>>, vector<3x128xf32>
    %201 = arith.truncf %200 : vector<3x128xf32> to vector<3x128xbf16>
    %c6_239 = arith.constant 6 : index
    %c0_240 = arith.constant 0 : index
    %c0_241 = arith.constant 0 : index
    %202 = vector.load %arg6[%c6_239, %c0_240, %c0_241] : memref<8x128x128xbf16, #tpu.memory_space<vmem>>, vector<1x128x128xbf16>
    %203 = vector.shape_cast %202 : vector<1x128x128xbf16> to vector<128x128xbf16>
    %cst_242 = arith.constant dense<0.000000e+00> : vector<3x128xf32>
    %204 = tpu.matmul %201, %203, %cst_242 {dimension_numbers = #tpu.dot_dimension_numbers<[1], [0], [0], [1], [0, 0, 1, 1], [], []>} : vector<3x128xbf16>, vector<128x128xbf16>, vector<3x128xf32> -> vector<3x128xf32>
    %c0_243 = arith.constant 0 : index
    %c0_244 = arith.constant 0 : index
    %205 = vector.load %arg14[%c0_243, %c0_244] : memref<3x128xf32, #tpu.memory_space<vmem>>, vector<3x128xf32>
    %206 = arith.addf %205, %204 : vector<3x128xf32>
    %c0_245 = arith.constant 0 : index
    %c0_246 = arith.constant 0 : index
    %207 = vector.load %arg14[%c0_245, %c0_246] : memref<3x128xf32, #tpu.memory_space<vmem>>, vector<3x128xf32>
    tpu.vector_store %arg14[%c0_245, %c0_246], %206 {strides = array<i32>} : memref<3x128xf32, #tpu.memory_space<vmem>>, vector<3x128xf32>,
    %c7_247 = arith.constant 7 : index
    %c0_248 = arith.constant 0 : index
    %208 = vector.load %arg13[%c7_247, %c0_248] : memref<16x128xf32, #tpu.memory_space<vmem>>, vector<3x128xf32>
    %209 = arith.truncf %208 : vector<3x128xf32> to vector<3x128xbf16>
    %c7_249 = arith.constant 7 : index
    %c0_250 = arith.constant 0 : index
    %c0_251 = arith.constant 0 : index
    %210 = vector.load %arg6[%c7_249, %c0_250, %c0_251] : memref<8x128x128xbf16, #tpu.memory_space<vmem>>, vector<1x128x128xbf16>
    %211 = vector.shape_cast %210 : vector<1x128x128xbf16> to vector<128x128xbf16>
    %cst_252 = arith.constant dense<0.000000e+00> : vector<3x128xf32>
    %212 = tpu.matmul %209, %211, %cst_252 {dimension_numbers = #tpu.dot_dimension_numbers<[1], [0], [0], [1], [0, 0, 1, 1], [], []>} : vector<3x128xbf16>, vector<128x128xbf16>, vector<3x128xf32> -> vector<3x128xf32>
    %c0_253 = arith.constant 0 : index
    %c0_254 = arith.constant 0 : index
    %213 = vector.load %arg14[%c0_253, %c0_254] : memref<3x128xf32, #tpu.memory_space<vmem>>, vector<3x128xf32>
    %214 = arith.addf %213, %212 : vector<3x128xf32>
    %c0_255 = arith.constant 0 : index
    %c0_256 = arith.constant 0 : index
    %215 = vector.load %arg14[%c0_255, %c0_256] : memref<3x128xf32, #tpu.memory_space<vmem>>, vector<3x128xf32>
    tpu.vector_store %arg14[%c0_255, %c0_256], %214 {strides = array<i32>} : memref<3x128xf32, #tpu.memory_space<vmem>>, vector<3x128xf32>,
    %c0_257 = arith.constant 0 : index
    %c0_258 = arith.constant 0 : index
    %216 = vector.load %arg7[%c0_257, %c0_258] : memref<1x128xf32, #tpu.memory_space<vmem>>, vector<1x128xf32>
    %c0_259 = arith.constant 0 : index
    %c0_260 = arith.constant 0 : index
    %217 = tpu.strided_load %arg14[%c0_259, %c0_260] {strides = array<i32: 2, 1>} : memref<3x128xf32, #tpu.memory_space<vmem>>, vector<1x128xf32>
    %c1_261 = arith.constant 1 : index
    %c0_262 = arith.constant 0 : index
    %218 = tpu.strided_load %arg14[%c1_261, %c0_262] {strides = array<i32: 2, 1>} : memref<3x128xf32, #tpu.memory_space<vmem>>, vector<1x128xf32>
    %219 = arith.maximumf %217, %218 : vector<1x128xf32>
    %220 = arith.addf %219, %216 : vector<1x128xf32>
    %cst_263 = arith.constant 0.000000e+00 : f32
    %221 = vector.broadcast %cst_263 : f32 to vector<1x128xf32>
    %222 = arith.maximumf %220, %221 : vector<1x128xf32>
    %c0_264 = arith.constant 0 : index
    %c0_265 = arith.constant 0 : index
    %c0_266 = arith.constant 0 : index
    %223 = vector.load %arg8[%c0_264, %c0_265, %c0_266] : memref<1x1x128xf32, #tpu.memory_space<vmem>>, vector<1x1x128xf32>
    %224 = vector.shape_cast %223 : vector<1x1x128xf32> to vector<1x128xf32>
    %225 = vector.shape_cast %222 : vector<1x128xf32> to vector<1x1x128xf32>
    tpu.vector_store %arg8[%c0_264, %c0_265, %c0_266], %225 {strides = array<i32>} : memref<1x1x128xf32, #tpu.memory_space<vmem>>, vector<1x1x128xf32>,
    return
  }
  func.func @transform_0(%arg0: i32) -> (i32, i32, i32) {
    %c0_i32 = arith.constant 0 : i32
    %c0_i32_0 = arith.constant 0 : i32
    %c0_i32_1 = arith.constant 0 : i32
    return %arg0, %c0_i32, %c0_i32_0 : i32, i32, i32
  }
  func.func @transform_1(%arg0: i32) -> (i32, i32, i32) {
    %c0_i32 = arith.constant 0 : i32
    %c0_i32_0 = arith.constant 0 : i32
    %c0_i32_1 = arith.constant 0 : i32
    %c0_i32_2 = arith.constant 0 : i32
    return %c0_i32, %c0_i32_0, %c0_i32_1 : i32, i32, i32
  }
  func.func @transform_2(%arg0: i32) -> (i32, i32) {
    %c0_i32 = arith.constant 0 : i32
    %c0_i32_0 = arith.constant 0 : i32
    %c0_i32_1 = arith.constant 0 : i32
    return %c0_i32, %c0_i32_0 : i32, i32
  }
  func.func @transform_3(%arg0: i32) -> (i32, i32, i32) {
    %c0_i32 = arith.constant 0 : i32
    %c0_i32_0 = arith.constant 0 : i32
    %c0_i32_1 = arith.constant 0 : i32
    %c0_i32_2 = arith.constant 0 : i32
    return %c0_i32, %c0_i32_0, %c0_i32_1 : i32, i32, i32
  }
  func.func @transform_4(%arg0: i32) -> (i32, i32) {
    %c0_i32 = arith.constant 0 : i32
    %c0_i32_0 = arith.constant 0 : i32
    %c0_i32_1 = arith.constant 0 : i32
    return %c0_i32, %c0_i32_0 : i32, i32
  }
  func.func @transform_5(%arg0: i32) -> (i32, i32, i32) {
    %c0_i32 = arith.constant 0 : i32
    %c0_i32_0 = arith.constant 0 : i32
    %c0_i32_1 = arith.constant 0 : i32
    %c0_i32_2 = arith.constant 0 : i32
    return %c0_i32, %c0_i32_0, %c0_i32_1 : i32, i32, i32
  }
  func.func @transform_6(%arg0: i32) -> (i32, i32) {
    %c0_i32 = arith.constant 0 : i32
    %c0_i32_0 = arith.constant 0 : i32
    %c0_i32_1 = arith.constant 0 : i32
    return %c0_i32, %c0_i32_0 : i32, i32
  }
  func.func @transform_7(%arg0: i32) -> (i32, i32, i32) {
    %c0_i32 = arith.constant 0 : i32
    %c0_i32_0 = arith.constant 0 : i32
    %c0_i32_1 = arith.constant 0 : i32
    return %arg0, %c0_i32, %c0_i32_0 : i32, i32, i32
  }
}

</mosaic_0001>

<bundles_post_ra>
// kernel: tpu_custom_call.1
= control target key start
LH: loop header
LB: loop body
LE: loop exit
PB: predicated region body
PF: predicated region fallthrough
CT: control target
= control target key end

     0   :  { %s4703_s0 = inlined_call_operand.vmem [shape: f32[2,128,64], index: 0, kind: input, shape index: {}]   ;;  %s4704_s1 = inlined_call_operand.hbm [shape: bf16[9,128,128], index: 1, kind: input, shape index: {}]   ;;  %s4705_s2 = inlined_call_operand.vmem [shape: f32[1,128], index: 2, kind: input, shape index: {}]   ;;  %s4706_s3 = inlined_call_operand.hbm [shape: bf16[8,128,128], index: 3, kind: input, shape index: {}]   ;;  %s4707_s4 = inlined_call_operand.vmem [shape: f32[1,128], index: 4, kind: input, shape index: {}]   ;;  %s4708_s5 = inlined_call_operand.hbm [shape: bf16[8,128,128], index: 5, kind: input, shape index: {}]   ;;  %s4709_s6 = inlined_call_operand.vmem [shape: f32[1,128], index: 6, kind: input, shape index: {}]   ;;  %s4710_s7 = inlined_call_operand.hbm [shape: f32[2,1,128], index: 7, kind: output, shape index: {}]  }
   0x1   :  { %4711 = sst [smem:[#allocation18_spill]] %s4704_s1 }
   0x2   :  { %12 = vsyncpa [#allocation9], 0 }
   0x3   :  { %13 = vsyncpa [#allocation12], 0 }
   0x4   :  { %14 = vsyncpa [#allocation10], 0 }
   0x5   :  { %16 = vsyncpa [#allocation10 + $0x1], 0  ;;  %s4379_s24 = smov 0   ;;  %s4381_s25 = smov 0  }
   0x6   :  { %s4383_s26 = smov 0   ;;  %s4385_s27 = smov 0  }
   0x7 LB: > { %s4400_s28 = sadd.s32 4294967295, %s4332_s27   ;;  %s3083_s29 = sadd.s32 4294967294, %s4332_s27   ;;  %s4332_s27 = sphi %s4385_s27, %s4720_s27   ;;  %s4328_s26 = sphi %s4383_s26, %s4719_s26   ;;  %s4324_s25 = sphi %s4381_s25, %s4718_s25   ;;  %s4320_s24 = sphi %s4379_s24, %s4717_s24  }
   0x8   : > { %s4404_s30 = sadd.s32 1, %s4332_s27   ;;  %s181_s8 = sadd.s32 1, %s4328_s26 }
   0x9   : > { %s178_s9 = ssub.s32 %s4332_s27, %s4404_s30  ;;  %p191_p0 = scmp.ne.s32.totalorder %s4328_s26, %s4324_s25 }
   0xa   : > { %p179_p1 = scmp.eq.s32.totalorder %s178_s9, 0  ;;  %p192_p2 = scmp.eq.s32.totalorder %s4400_s28, 1 }
   0xb   : > { %p197_p3 = scmp.ne.s32.totalorder %s4324_s25, %s4320_s24  ;;  %p198_p4 = scmp.eq.s32.totalorder %s3083_s29, 1 }
   0xc   : > { %s4415_s10 = scalar_select %p179_p1, %s4328_s26, %s181_s8  }
   0xd   : > { %p4417_p5 = por %p192_p2, %p191_p0  ;;  %p4421_p6 = por %p198_p4, %p197_p3 }
   0xe   : > { %p3084_p7 = scmp.ge.s32.totalorder %s4332_s27, 1  ;;  %p205_p8 = scmp.lt.s32.totalorder %s4332_s27, 3 }
   0xf   : > { %p4126_p9 = scmp.eq.s32.totalorder %s4400_s28, 0  ;;  %s233_s16 = sshll.u32 %s4706_s3, 4  ;;  %s234_s16 = int_to_ptr.hbm [resolvable:$true] %s233_s16 }
  0x10   : > { %p4428_p10 = pnand %p3084_p7, %p205_p8  ;;  %s4715_s1 = sld [smem:[#allocation18_spill]] }
  0x11   : > { %s4334_s21 = smov [#allocation11]   ;;  %s4335_s23 = smov 64  }
  0x12   : > { %p4112_p11 = pneg %p4428_p10  ;;  %s235_s22 = sshll.u32 %s4334_s21, 4  ;;  %s236_s22 = int_to_ptr.vmem [resolvable:$true] %s235_s22 }
  0x13   : > { %s4336_s29 = smov 4   ;;  %s4337_s8 = smov [#allocation8]  }
  0x14   : > { %p4442_p12 = pnand %p4126_p9, %p4112_p11  ;;  %s218_s9 = sshll.u32 %s4337_s8, 4  ;;  %s219_s9 = int_to_ptr.vmem [resolvable:$true] %s218_s9 }
  0x15   : > { %s250_s17 = sshll.u32 %s4708_s5, 4  ;;  %s4338_s18 = smov [#allocation13]   ;;  %s251_s17 = int_to_ptr.hbm [resolvable:$true] %s250_s17 }
  0x16   : > { %s216_s19 = sshll.u32 %s4715_s1, 4  ;;  %s252_s1 = sshll.u32 %s4338_s18, 4  ;;  %s217_s19 = int_to_ptr.hbm [resolvable:$true] %s216_s19  ;;  %s253_s1 = int_to_ptr.vmem [resolvable:$true] %s252_s1 }
  0x17   : > { %4118 = dma.hbm_to_vmem [thread:$0]  (!%p4442_p12), %s234_s16, 8192, %s236_s22, [#allocation12], %s4335_s23, %s4335_s23, %s4336_s29  }
  0x18   : > { %4115 = dma.hbm_to_vmem [thread:$0]  (!%p4442_p12), %s217_s19, 9216, %s219_s9, [#allocation9], %s4335_s23, %s4335_s23, %s4336_s29  }
  0x19   : > { %4121 = dma.hbm_to_vmem [thread:$0]  (!%p4442_p12), %s251_s17, 8192, %s253_s1, [#allocation12], %s4335_s23, %s4335_s23, %s4336_s29  }
  0x1a   : > { %279 = sbr.rel (%p4428_p10) target bundleno = 964 (0x3c4), region = 48 }
  0x1f   : > { %4307 = dma.done.wait (%p4126_p9), [#allocation9], 9216  }
  0x20   : > { %4309 = vsyncadd (%p4126_p9), [#allocation9], 4294958080 }
  0x21   : > { %4311 = dma.done.wait (%p4126_p9), [#allocation12], 16384  }
  0x22   : > { %4313 = vsyncadd (%p4126_p9), [#allocation12], 4294950912  ;;  %p321_p13 = scmp.lt.s32.totalorder %s4400_s28, 1  ;;  %v3905_v12 = vld [vmem:[#allocation8 + $0x38] sm:$0xff]  ;;  %v3904_v16 = vld [vmem:[#allocation8 + $0x30] sm:$0xff]  ;;  %s319_s8 = sand.u32 1, %s4324_s25  }
  0x23   : > { %v3913_v13 = vld [vmem:[#allocation8 + $0x78] sm:$0xff]  ;;  %457 = vmatpush.bf16.msra.mxu0 %v3905_v12  ;;  %v3903_v18 = vld [vmem:[#allocation8 + $0x28] sm:$0xff]  ;;  %v3902_v22 = vld [vmem:[#allocation8 + $0x20] sm:$0xff]  ;;  %s2993_s18 = scalar_lea.hbm %s4710_s7, %s4400_s28  ;;  %s2985_s13 = scalar_lea.sflag [#allocation10], %s319_s8 }
  0x24   : > { %s322_s16 = scalar_select %p321_p13, %s4400_s28, 1  ;;  %v3921_v14 = vld [vmem:[#allocation8 + $0xb8] sm:$0xff]  ;;  %568 = vmatpush.bf16.msra.mxu1 %v3913_v13  ;;  %v3912_v24 = vld [vmem:[#allocation8 + $0x70] sm:$0xff]  ;;  %v3911_v28 = vld [vmem:[#allocation8 + $0x68] sm:$0xff] }
  0x25   : > { %v3929_v15 = vld [vmem:[#allocation8 + $0xf8] sm:$0xff]  ;;  %693 = vmatpush.bf16.msra.mxu2 %v3921_v14  ;;  %v3920_v25 = vld [vmem:[#allocation8 + $0xb0] sm:$0xff]  ;;  %v3919_v29 = vld [vmem:[#allocation8 + $0xa8] sm:$0xff]  ;;  %s2997_s19 = sshll.u32 %s2993_s18, 4  ;;  %s4282_s23 = scalar_lea.hbm %s4710_s7, 2  ;;  %s2998_s19 = int_to_ptr.hbm [resolvable:$true] %s2997_s19 }
  0x26   : > { %s3897_s1 = sshll.u32 %s322_s16, 7  ;;  %818 = vmatpush.bf16.msra.mxu3 %v3929_v15  ;;  %v3901_v23 = vld [vmem:[#allocation8 + $0x18] sm:$0xff]  ;;  %v3928_v26 = vld [vmem:[#allocation8 + $0xf0] sm:$0xff]  ;;  %v3927_v30 = vld [vmem:[#allocation8 + $0xe8] sm:$0xff]  ;;  %s320_s16 = scalar_lea.vmem [#allocation14], %s319_s8 }
  0x27   : > { %s4470_s20 = scalar_lea.vmem %s4703_s0, %s3897_s1  ;;  %458 = vmatpush.bf16.msra.mxu0 %v3904_v16  ;;  %v3900_v27 = vld [vmem:[#allocation8 + $0x10] sm:$0xff]  ;;  %v3899_v31 = vld [vmem:[#allocation8 + $0x8] sm:$0xff]  ;;  %v3910_v32 = vld [vmem:[#allocation8 + $0x60] sm:$0xff]  ;;  %s2995_s1 = sshll.u32 %s320_s16, 4  ;;  %s2996_s1 = int_to_ptr.vmem [resolvable:$true] %s2995_s1 }
  0x28   : > { %v326_v0 = vld [vmem:[%s4470_s20] sm:$0xff]  ;;  %v327_v1 = vld [vmem:[%s4470_s20 + $0x8] sm:$0xff]  ;;  %v328_v2 = vld [vmem:[%s4470_s20 + $0x10] sm:$0xff]  ;;  %569 = vmatpush.bf16.msra.mxu1 %v3912_v24 }
  0x29   : > { %342 = vxpose.xlu0.b32.start [1/16] (narrow) %v326_v0, 64  ;;  %v329_v3 = vld [vmem:[%s4470_s20 + $0x18] sm:$0xff]  ;;  %v330_v4 = vld [vmem:[%s4470_s20 + $0x20] sm:$0xff]  ;;  %v331_v5 = vld [vmem:[%s4470_s20 + $0x28] sm:$0xff]  ;;  %694 = vmatpush.bf16.msra.mxu2 %v3920_v25 }
  0x2a   : > { %v332_v6 = vld [vmem:[%s4470_s20 + $0x30] sm:$0xff]  ;;  %v333_v7 = vld [vmem:[%s4470_s20 + $0x38] sm:$0xff]  ;;  %v334_v8 = vld [vmem:[%s4470_s20 + $0x40] sm:$0xff]  ;;  %819 = vmatpush.bf16.msra.mxu3 %v3928_v26 }
  0x2b   : > { %v335_v9 = vld [vmem:[%s4470_s20 + $0x48] sm:$0xff]  ;;  %v336_v10 = vld [vmem:[%s4470_s20 + $0x50] sm:$0xff]  ;;  %v337_v11 = vld [vmem:[%s4470_s20 + $0x58] sm:$0xff]  ;;  %459 = vmatpush.bf16.msra.mxu0 %v3903_v18 }
  0x2c   : > { %v338_v17 = vld [vmem:[%s4470_s20 + $0x60] sm:$0xff]  ;;  %v339_v19 = vld [vmem:[%s4470_s20 + $0x68] sm:$0xff]  ;;  %v340_v20 = vld [vmem:[%s4470_s20 + $0x70] sm:$0xff]  ;;  %570 = vmatpush.bf16.msra.mxu1 %v3911_v28 }
  0x2d   : > { %v341_v21 = vld [vmem:[%s4470_s20 + $0x78] sm:$0xff]  ;;  %695 = vmatpush.bf16.msra.mxu2 %v3919_v29  ;;  %v3918_v33 = vld [vmem:[#allocation8 + $0xa0] sm:$0xff]  ;;  %v3907_v43 = vld [vmem:[#allocation8 + $0x48] sm:$0xff]  ;;  %s4276_s20 = sshra.s32 %s2998_s19, 4  ;;  %s4277_s20 = int_to_ptr.hbm [resolvable:$true] %s4276_s20 }
  0x2e   : > { %820 = vmatpush.bf16.msra.mxu3 %v3927_v30  ;;  %v3926_v34 = vld [vmem:[#allocation8 + $0xe0] sm:$0xff]  ;;  %v3909_v36 = vld [vmem:[#allocation8 + $0x58] sm:$0xff]  ;;  %v3908_v39 = vld [vmem:[#allocation8 + $0x50] sm:$0xff]  ;;  %s4278_s21 = scalar_lea.hbm %s4277_s20, 1  ;;  %p4283_p3 = scmp.lt.s32.totalorder %s4277_s20, %s4710_s7 }
  0x2f   : > { %460 = vmatpush.bf16.msra.mxu0 %v3902_v22  ;;  %v3898_v35 = vld [vmem:[#allocation8] sm:$0xff]  ;;  %v3917_v37 = vld [vmem:[#allocation8 + $0x98] sm:$0xff]  ;;  %v3916_v40 = vld [vmem:[#allocation8 + $0x90] sm:$0xff]  ;;  %p4279_p0 = scmp.ne.s32.totalorder %s4277_s20, %s4278_s21  ;;  %p4284_p4 = scmp.lt.s32.totalorder %s4282_s23, %s4278_s21 }
  0x30   : > { %571 = vmatpush.bf16.msra.mxu1 %v3910_v32  ;;  %v3925_v38 = vld [vmem:[#allocation8 + $0xd8] sm:$0xff]  ;;  %v3924_v41 = vld [vmem:[#allocation8 + $0xd0] sm:$0xff]  ;;  %v3915_v44 = vld [vmem:[#allocation8 + $0x88] sm:$0xff] }
  0x31   : > { %343 = vxpose.xlu0.b32.cont [2/16] (narrow) %v327_v1, 64  ;;  %696 = vmatpush.bf16.msra.mxu2 %v3918_v33  ;;  %v3937_v42 = vld [vmem:[#allocation8 + $0x138] sm:$0xff]  ;;  %v3923_v45 = vld [vmem:[#allocation8 + $0xc8] sm:$0xff]  ;;  %v3906_v46 = vld [vmem:[#allocation8 + $0x40] sm:$0xff]  ;;  %p4280_p1 = pnand %p4279_p0, %p4417_p5  ;;  %p4285_p7 = por %p4284_p4, %p4283_p3 }
  0x32   : > { %821 = vmatpush.bf16.msra.mxu3 %v3926_v34  ;;  %v3914_v47 = vld [vmem:[#allocation8 + $0x80] sm:$0xff]  ;;  %v3936_v49 = vld [vmem:[#allocation8 + $0x130] sm:$0xff]  ;;  %v3935_v51 = vld [vmem:[#allocation8 + $0x128] sm:$0xff] }
  0x33   : > { %461 = vmatpush.bf16.msra.mxu0 %v3901_v23  ;;  %v3922_v48 = vld [vmem:[#allocation8 + $0xc0] sm:$0xff]  ;;  %v3933_v56 = vld [vmem:[#allocation8 + $0x118] sm:$0xff]  ;;  %v3931_v12 = vld [vmem:[#allocation8 + $0x108] sm:$0xff]  ;;  %p4281_p2 = pneg %p4280_p1 }
  0x34   : > { %572 = vmatpush.bf16.msra.mxu1 %v3909_v36  ;;  %v3934_v54 = vld [vmem:[#allocation8 + $0x120] sm:$0xff]  ;;  %v3945_v57 = vld [vmem:[#allocation8 + $0x178] sm:$0xff]  ;;  %v3943_v13 = vld [vmem:[#allocation8 + $0x168] sm:$0xff] }
  0x35   : > { %697 = vmatpush.bf16.msra.mxu2 %v3917_v37  ;;  %v3951_v15 = vld [vmem:[#allocation8 + $0x1a8] sm:$0xff]  ;;  %v3942_v18 = vld [vmem:[#allocation8 + $0x160] sm:$0xff]  ;;  %v3941_v33 = vld [vmem:[#allocation8 + $0x158] sm:$0xff]  ;;  %p4286_p8 = pnand %p4285_p7, %p4281_p2 }
  0x36   : > { %822 = vmatpush.bf16.msra.mxu3 %v3925_v38  ;;  %v3959_v16 = vld [vmem:[#allocation8 + $0x1e8] sm:$0xff]  ;;  %v3930_v32 = vld [vmem:[#allocation8 + $0x100] sm:$0xff]  ;;  %v3949_v34 = vld [vmem:[#allocation8 + $0x198] sm:$0xff] }
  0x37   : > { %462 = vmatpush.bf16.msra.mxu0 %v3900_v27  ;;  %v3940_v36 = vld [vmem:[#allocation8 + $0x150] sm:$0xff]  ;;  %v3969_v37 = vld [vmem:[#allocation8 + $0x238] sm:$0xff] }
  0x38   : > { %573 = vmatpush.bf16.msra.mxu1 %v3908_v39  ;;  %v3948_v38 = vld [vmem:[#allocation8 + $0x190] sm:$0xff] }
  0x39   : > { %344 = vxpose.xlu0.b32.cont [3/16] (narrow) %v328_v2, 64  ;;  %698 = vmatpush.bf16.msra.mxu2 %v3916_v40  ;;  %v3956_v39 = vld [vmem:[#allocation8 + $0x1d0] sm:$0xff] }
  0x3a   : > { %823 = vmatpush.bf16.msra.mxu3 %v3924_v41  ;;  %v3939_v41 = vld [vmem:[#allocation8 + $0x148] sm:$0xff] }
  0x3b   : > { %463 = vmatpush.bf16.msra.mxu0 %v3899_v31 }
  0x3c   : > { %574 = vmatpush.bf16.msra.mxu1 %v3907_v43  ;;  %v3947_v43 = vld [vmem:[#allocation8 + $0x188] sm:$0xff] }
  0x3d   : > { %699 = vmatpush.bf16.msra.mxu2 %v3915_v44  ;;  %v3955_v44 = vld [vmem:[#allocation8 + $0x1c8] sm:$0xff] }
  0x3e   : > { %824 = vmatpush.bf16.msra.mxu3 %v3923_v45  ;;  %v3938_v45 = vld [vmem:[#allocation8 + $0x140] sm:$0xff] }
  0x3f   : > { %464 = vmatpush.bf16.msra.mxu0 %v3898_v35  ;;  %v3957_v35 = vld [vmem:[#allocation8 + $0x1d8] sm:$0xff] }
  0x40   : > { %575 = vmatpush.bf16.msra.mxu1 %v3906_v46  ;;  %v3946_v46 = vld [vmem:[#allocation8 + $0x180] sm:$0xff] }
  0x41   : > { %345 = vxpose.xlu0.b32.cont [4/16] (narrow) %v329_v3, 64  ;;  %700 = vmatpush.bf16.msra.mxu2 %v3914_v47  ;;  %v3954_v47 = vld [vmem:[#allocation8 + $0x1c0] sm:$0xff] }
  0x42   : > { %825 = vmatpush.bf16.msra.mxu3 %v3922_v48 }
  0x43   : > { %943 = vmatpush.bf16.msrb.mxu0 %v3937_v42 }
  0x44   : > { %1068 = vmatpush.bf16.msrb.mxu1 %v3945_v57 }
  0x47   : > { %944 = vmatpush.bf16.msrb.mxu0 %v3936_v49 }
  0x49   : > { %346 = vxpose.xlu0.b32.cont [5/16] (narrow) %v330_v4, 64 }
  0x4b   : > { %945 = vmatpush.bf16.msrb.mxu0 %v3935_v51 }
  0x4f   : > { %946 = vmatpush.bf16.msrb.mxu0 %v3934_v54 }
  0x51   : > { %347 = vxpose.xlu0.b32.cont [6/16] (narrow) %v331_v5, 64 }
  0x53   : > { %947 = vmatpush.bf16.msrb.mxu0 %v3933_v56 }
  0x59   : > { %348 = vxpose.xlu0.b32.cont [7/16] (narrow) %v332_v6, 64  ;;  %v3953_v6 = vld [vmem:[#allocation8 + $0x1b8] sm:$0xff] }
  0x5a   : > { %1193 = vmatpush.bf16.msrb.mxu2 %v3953_v6 }
  0x61   : > { %349 = vxpose.xlu0.b32.cont [8/16] (narrow) %v333_v7, 64  ;;  %v3961_v7 = vld [vmem:[#allocation8 + $0x1f8] sm:$0xff] }
  0x62   : > { %1318 = vmatpush.bf16.msrb.mxu3 %v3961_v7 }
  0x69   : > { %350 = vxpose.xlu0.b32.cont [9/16] (narrow) %v334_v8, 64  ;;  %v3932_v8 = vld [vmem:[#allocation8 + $0x110] sm:$0xff] }
  0x6a   : > { %948 = vmatpush.bf16.msrb.mxu0 %v3932_v8 }
  0x6e   : > { %949 = vmatpush.bf16.msrb.mxu0 %v3931_v12 }
  0x71   : > { %351 = vxpose.xlu0.b32.cont [10/16] (narrow) %v335_v9, 64  ;;  %v3944_v9 = vld [vmem:[#allocation8 + $0x170] sm:$0xff] }
  0x72   : > { %1069 = vmatpush.bf16.msrb.mxu1 %v3944_v9  ;;  %950 = vmatpush.bf16.msrb.mxu0 %v3930_v32 }
  0x76   : > { %1070 = vmatpush.bf16.msrb.mxu1 %v3943_v13 }
  0x79   : > { %352 = vxpose.xlu0.b32.cont [11/16] (narrow) %v336_v10, 64  ;;  %v3952_v10 = vld [vmem:[#allocation8 + $0x1b0] sm:$0xff] }
  0x7a   : > { %1194 = vmatpush.bf16.msrb.mxu2 %v3952_v10  ;;  %1071 = vmatpush.bf16.msrb.mxu1 %v3942_v18  ;;  %v3966_v10 = vld [vmem:[#allocation8 + $0x220] sm:$0xff] }
  0x7e   : > { %1195 = vmatpush.bf16.msrb.mxu2 %v3951_v15  ;;  %1072 = vmatpush.bf16.msrb.mxu1 %v3941_v33 }
  0x81   : > { %353 = vxpose.xlu0.b32.cont [12/16] (narrow) %v337_v11, 64  ;;  %v3960_v11 = vld [vmem:[#allocation8 + $0x1f0] sm:$0xff] }
  0x82   : > { %1319 = vmatpush.bf16.msrb.mxu3 %v3960_v11  ;;  %1073 = vmatpush.bf16.msrb.mxu1 %v3940_v36  ;;  %v3965_v11 = vld [vmem:[#allocation8 + $0x218] sm:$0xff] }
  0x86   : > { %1320 = vmatpush.bf16.msrb.mxu3 %v3959_v16  ;;  %1074 = vmatpush.bf16.msrb.mxu1 %v3939_v41 }
  0x89   : > { %354 = vxpose.xlu0.b32.cont [13/16] (narrow) %v338_v17, 64 }
  0x8a   : > { %1075 = vmatpush.bf16.msrb.mxu1 %v3938_v45 }
  0x91   : > { %355 = vxpose.xlu0.b32.cont [14/16] (narrow) %v339_v19, 64  ;;  %v3950_v19 = vld [vmem:[#allocation8 + $0x1a0] sm:$0xff] }
  0x92   : > { %1196 = vmatpush.bf16.msrb.mxu2 %v3950_v19 }
  0x96   : > { %1197 = vmatpush.bf16.msrb.mxu2 %v3949_v34 }
  0x99   : > { %356 = vxpose.xlu0.b32.cont [15/16] (narrow) %v340_v20, 64  ;;  %v3958_v20 = vld [vmem:[#allocation8 + $0x1e0] sm:$0xff] }
  0x9a   : > { %1321 = vmatpush.bf16.msrb.mxu3 %v3958_v20  ;;  %1198 = vmatpush.bf16.msrb.mxu2 %v3948_v38 }
  0x9e   : > { %1322 = vmatpush.bf16.msrb.mxu3 %v3957_v35  ;;  %1199 = vmatpush.bf16.msrb.mxu2 %v3947_v43  ;;  %v3962_v35 = vld [vmem:[#allocation8 + $0x200] sm:$0xff] }
  0xa1   : > { %357 = vxpose.xlu0.b32.end [16/16] (narrow) %v341_v21, 64 }
  0xa2   : > { %1323 = vmatpush.bf16.msrb.mxu3 %v3956_v39  ;;  %1200 = vmatpush.bf16.msrb.mxu2 %v3946_v46 }
  0xa6   : > { %1324 = vmatpush.bf16.msrb.mxu3 %v3955_v44 }
  0xaa   : > { %1325 = vmatpush.bf16.msrb.mxu3 %v3954_v47 }
  0xcd   : > { %v358_v50 = vpop.trf.xlu0 }
  0xce   : > { %374 = vst [vmem:[#allocation2] sm:$0xff] %v358_v50 }
  0xd5   : > { %v4488_v52 = vpop.trf.xlu0 }
  0xd6   : > { %375 = vst [vmem:[#allocation2 + $0x8] sm:$0xff] %v4488_v52  ;;  %v389_v53 = vpack.c.bf16 %v4488_v52, %v358_v50 }
  0xd8   : > { %465 = vmatmul.bf16.vlgmr.msra.gmra.mxu0 %v389_v53 }
  0xd9   : > { %1443 = vmatpush.bf16.msra.mxu0 %v3969_v37 }
  0xdd   : > { %v4492_v55 = vpop.trf.xlu0  ;;  %v492_v59 = vld [vmem:[#allocation2 + $0x1] sm:$0xff] }
  0xde   : > { %376 = vst [vmem:[#allocation2 + $0x10] sm:$0xff] %v4492_v55  ;;  %v1374_v58 = vpack.c.bf16 %v4492_v55, %v4488_v52  ;;  %v617_v60 = vld [vmem:[#allocation2 + $0x2] sm:$0xff] }
  0xdf   : > { %v742_v61 = vld [vmem:[#allocation2 + $0x3] sm:$0xff] }
  0xe0   : > { %v867_v7 = vld [vmem:[#allocation2 + $0x4] sm:$0xff] }
  0xe1   : > { %v992_v18 = vld [vmem:[#allocation2 + $0x5] sm:$0xff] }
  0xe2   : > { %v1117_v19 = vld [vmem:[#allocation2 + $0x6] sm:$0xff] }
  0xe5   : > { %v4497_v62 = vpop.trf.xlu0  ;;  %v493_v63 = vld [vmem:[#allocation2 + $0x9] sm:$0xff] }
  0xe6   : > { %v618_v0 = vld [vmem:[#allocation2 + $0xa] sm:$0xff]  ;;  %377 = vst [vmem:[#allocation2 + $0x18] sm:$0xff] %v4497_v62  ;;  %v499_v2 = vpack.c.bf16 %v493_v63, %v492_v59  ;;  %v390_v5 = vpack.c.bf16 %v4497_v62, %v4492_v55  ;;  %v3968_v63 = vld [vmem:[#allocation8 + $0x230] sm:$0xff] }
  0xe7   : > { %v743_v1 = vld [vmem:[#allocation2 + $0xb] sm:$0xff]  ;;  %v624_v3 = vpack.c.bf16 %v618_v0, %v617_v60  ;;  %1444 = vmatpush.bf16.msra.mxu0 %v3968_v63 }
  0xe8   : > { %v749_v4 = vpack.c.bf16 %v743_v1, %v742_v61  ;;  %576 = vmatmul.bf16.vlgmr.msra.gmra.mxu1 %v499_v2  ;;  %470 = vmatmul.bf16.gmra.mxu0 %v390_v5  ;;  %v3967_v0 = vld [vmem:[#allocation8 + $0x228] sm:$0xff] }
  0xe9   : > { %701 = vmatmul.bf16.vlgmr.msra.gmra.mxu2 %v624_v3  ;;  %v993_v12 = vld [vmem:[#allocation2 + $0xd] sm:$0xff] }
  0xea   : > { %826 = vmatmul.bf16.vlgmr.msra.gmra.mxu3 %v749_v4  ;;  %v868_v4 = vld [vmem:[#allocation2 + $0xc] sm:$0xff]  ;;  %v999_v20 = vpack.c.bf16 %v993_v12, %v992_v18 }
  0xeb   : > { %1445 = vmatpush.bf16.msra.mxu0 %v3967_v0  ;;  %v874_v9 = vpack.c.bf16 %v868_v4, %v867_v7  ;;  %v1118_v13 = vld [vmem:[#allocation2 + $0xe] sm:$0xff] }
  0xec   : > { %v1243_v15 = vld [vmem:[#allocation2 + $0xf] sm:$0xff] }
  0xed   : > { %v4502_v14 = vpop.trf.xlu0  ;;  %v494_v21 = vld [vmem:[#allocation2 + $0x11] sm:$0xff] }
  0xee   : > { %378 = vst [vmem:[#allocation2 + $0x20] sm:$0xff] %v4502_v14  ;;  %v1375_v17 = vpack.c.bf16 %v4502_v14, %v4497_v62  ;;  %v619_v22 = vld [vmem:[#allocation2 + $0x12] sm:$0xff] }
  0xef   : > { %v744_v23 = vld [vmem:[#allocation2 + $0x13] sm:$0xff]  ;;  %1446 = vmatpush.bf16.msra.mxu0 %v3966_v10 }
  0xf0   : > { %v994_v33 = vld [vmem:[#allocation2 + $0x15] sm:$0xff] }
  0xf1   : > { %v1119_v34 = vld [vmem:[#allocation2 + $0x16] sm:$0xff] }
  0xf2   : > { %v1244_v38 = vld [vmem:[#allocation2 + $0x17] sm:$0xff] }
  0xf3   : > { %1447 = vmatpush.bf16.msra.mxu0 %v3965_v11 }
  0xf5   : > { %v4507_v24 = vpop.trf.xlu0  ;;  %v495_v25 = vld [vmem:[#allocation2 + $0x19] sm:$0xff] }
  0xf6   : > { %v620_v26 = vld [vmem:[#allocation2 + $0x1a] sm:$0xff]  ;;  %379 = vst [vmem:[#allocation2 + $0x28] sm:$0xff] %v4507_v24  ;;  %v500_v28 = vpack.c.bf16 %v495_v25, %v494_v21  ;;  %v391_v31 = vpack.c.bf16 %v4507_v24, %v4502_v14  ;;  %v1124_v21 = vpack.c.bf16 %v1118_v13, %v1117_v19 }
  0xf7   : > { %v745_v27 = vld [vmem:[#allocation2 + $0x1b] sm:$0xff]  ;;  %v625_v29 = vpack.c.bf16 %v620_v26, %v619_v22  ;;  %v1242_v22 = vld [vmem:[#allocation2 + $0x7] sm:$0xff] }
  0xf8   : > { %v750_v30 = vpack.c.bf16 %v745_v27, %v744_v23  ;;  %581 = vmatmul.bf16.gmra.mxu1 %v500_v28  ;;  %475 = vmatmul.bf16.gmra.mxu0 %v391_v31  ;;  %v870_v16 = vld [vmem:[#allocation2 + $0x1c] sm:$0xff]  ;;  %v869_v23 = vld [vmem:[#allocation2 + $0x14] sm:$0xff]  ;;  %v1249_v25 = vpack.c.bf16 %v1243_v15, %v1242_v22  ;;  %v3963_v28 = vld [vmem:[#allocation8 + $0x208] sm:$0xff] }
  0xf9   : > { %706 = vmatmul.bf16.gmra.mxu2 %v625_v29  ;;  %v875_v26 = vpack.c.bf16 %v870_v16, %v869_v23  ;;  %v3964_v27 = vld [vmem:[#allocation8 + $0x210] sm:$0xff]  ;;  %v995_v29 = vld [vmem:[#allocation2 + $0x1d] sm:$0xff] }
  0xfa   : > { %831 = vmatmul.bf16.gmra.mxu3 %v750_v30  ;;  %1448 = vmatpush.bf16.msra.mxu0 %v3964_v27  ;;  %v1120_v30 = vld [vmem:[#allocation2 + $0x1e] sm:$0xff]  ;;  %v1000_v36 = vpack.c.bf16 %v995_v29, %v994_v33 }
  0xfb   : > { %v1245_v31 = vld [vmem:[#allocation2 + $0x1f] sm:$0xff]  ;;  %v1125_v37 = vpack.c.bf16 %v1120_v30, %v1119_v34 }
  0xfc   : > { %v1250_v41 = vpack.c.bf16 %v1245_v31, %v1244_v38 }
  0xfd   : > { %v4512_v40 = vpop.trf.xlu0  ;;  %v496_v48 = vld [vmem:[#allocation2 + $0x21] sm:$0xff] }
  0xfe   : > { %380 = vst [vmem:[#allocation2 + $0x30] sm:$0xff] %v4512_v40  ;;  %v1376_v42 = vpack.c.bf16 %v4512_v40, %v4507_v24  ;;  %v621_v49 = vld [vmem:[#allocation2 + $0x22] sm:$0xff]  ;;  %v392_v57 = vpack.c.bf16 %v4512_v40, %v4512_v40  ;;  %1449 = vmatpush.bf16.msra.mxu0 %v3963_v28 }
  0xff   : > { %v746_v50 = vld [vmem:[#allocation2 + $0x23] sm:$0xff] }
 0x100   : > { %v871_v39 = vld [vmem:[#allocation2 + $0x24] sm:$0xff] }
 0x102   : > { %1450 = vmatpush.bf16.msra.mxu0 %v3962_v35 }
 0x105   : > { %v4517_v51 = vpop.trf.xlu0  ;;  %v497_v53 = vld [vmem:[#allocation2 + $0x29] sm:$0xff] }
 0x106   : > { %v622_v54 = vld [vmem:[#allocation2 + $0x2a] sm:$0xff]  ;;  %381 = vst [vmem:[#allocation2 + $0x38] sm:$0xff] %v4517_v51  ;;  %v501_v59 = vpack.c.bf16 %v497_v53, %v496_v48 }
 0x107   : > { %v747_v56 = vld [vmem:[#allocation2 + $0x2b] sm:$0xff]  ;;  %v626_v60 = vpack.c.bf16 %v622_v54, %v621_v49 }
 0x108   : > { %v751_v61 = vpack.c.bf16 %v747_v56, %v746_v50  ;;  %586 = vmatmul.bf16.gmra.mxu1 %v501_v59  ;;  %480 = vmatmul.bf16.gmra.mxu0 %v392_v57  ;;  %v872_v32 = vld [vmem:[#allocation2 + $0x2c] sm:$0xff] }
 0x109   : > { %711 = vmatmul.bf16.gmra.mxu2 %v626_v60  ;;  %v876_v43 = vpack.c.bf16 %v872_v32, %v871_v39  ;;  %v997_v44 = vld [vmem:[#allocation2 + $0x2d] sm:$0xff]  ;;  %v996_v48 = vld [vmem:[#allocation2 + $0x25] sm:$0xff] }
 0x10a   : > { %836 = vmatmul.bf16.gmra.mxu3 %v751_v61  ;;  %v1122_v45 = vld [vmem:[#allocation2 + $0x2e] sm:$0xff]  ;;  %v1121_v49 = vld [vmem:[#allocation2 + $0x26] sm:$0xff]  ;;  %v1001_v50 = vpack.c.bf16 %v997_v44, %v996_v48 }
 0x10b   : > { %v1247_v46 = vld [vmem:[#allocation2 + $0x2f] sm:$0xff]  ;;  %v1126_v53 = vpack.c.bf16 %v1122_v45, %v1121_v49  ;;  %v1246_v54 = vld [vmem:[#allocation2 + $0x27] sm:$0xff] }
 0x10c   : > { %v1251_v56 = vpack.c.bf16 %v1247_v46, %v1246_v54 }
 0x10d   : > { %v498_v1 = vld [vmem:[#allocation2 + $0x31] sm:$0xff] }
 0x10e   : > { %v623_v2 = vld [vmem:[#allocation2 + $0x32] sm:$0xff]  ;;  %v502_v5 = vpack.c.bf16 %v498_v1, %v498_v1 }
 0x10f   : > { %v748_v3 = vld [vmem:[#allocation2 + $0x33] sm:$0xff]  ;;  %v627_v6 = vpack.c.bf16 %v623_v2, %v623_v2 }
 0x110   : > { %v752_v8 = vpack.c.bf16 %v748_v3, %v748_v3  ;;  %v873_v47 = vld [vmem:[#allocation2 + $0x34] sm:$0xff] }
 0x111   : > { %v877_v57 = vpack.c.bf16 %v873_v47, %v873_v47  ;;  %v998_v59 = vld [vmem:[#allocation2 + $0x35] sm:$0xff] }
 0x112   : > { %v1123_v60 = vld [vmem:[#allocation2 + $0x36] sm:$0xff]  ;;  %v1002_v0 = vpack.c.bf16 %v998_v59, %v998_v59 }
 0x113   : > { %v1248_v61 = vld [vmem:[#allocation2 + $0x37] sm:$0xff]  ;;  %v1127_v1 = vpack.c.bf16 %v1123_v60, %v1123_v60 }
 0x114   : > { %v1252_v2 = vpack.c.bf16 %v1248_v61, %v1248_v61 }
 0x118   : > { %591 = vmatmul.bf16.gmra.mxu1 %v502_v5  ;;  %951 = vmatmul.bf16.vlgmr.msrb.gmra.mxu0 %v874_v9 }
 0x119   : > { %716 = vmatmul.bf16.gmra.mxu2 %v627_v6 }
 0x11a   : > { %841 = vmatmul.bf16.gmra.mxu3 %v752_v8 }
 0x128   : > { %1076 = vmatmul.bf16.vlgmr.msrb.gmra.mxu1 %v999_v20  ;;  %956 = vmatmul.bf16.gmra.mxu0 %v875_v26  ;;  %v1377_v26 = vpack.c.bf16 %v4517_v51, %v4517_v51 }
 0x129   : > { %1201 = vmatmul.bf16.vlgmr.msrb.gmra.mxu2 %v1124_v21 }
 0x12a   : > { %1326 = vmatmul.bf16.vlgmr.msrb.gmra.mxu3 %v1249_v25 }
 0x138   : > { %1081 = vmatmul.bf16.gmra.mxu1 %v1000_v36  ;;  %961 = vmatmul.bf16.gmra.mxu0 %v876_v43 }
 0x139   : > { %1206 = vmatmul.bf16.gmra.mxu2 %v1125_v37 }
 0x13a   : > { %1331 = vmatmul.bf16.gmra.mxu3 %v1250_v41 }
 0x148   : > { %1086 = vmatmul.bf16.gmra.mxu1 %v1001_v50  ;;  %966 = vmatmul.bf16.gmra.mxu0 %v877_v57 }
 0x149   : > { %1211 = vmatmul.bf16.gmra.mxu2 %v1126_v53 }
 0x14a   : > { %1336 = vmatmul.bf16.gmra.mxu3 %v1251_v56 }
 0x155   : > { %v466_v63 = vpop.f32.mrf.mxu0 }
 0x158   : > { %1091 = vmatmul.bf16.gmra.mxu1 %v1002_v0  ;;  %1451 = vmatmul.bf16.vlgmr.msra.gmra.mxu0 %v1374_v58 }
 0x159   : > { %1216 = vmatmul.bf16.gmra.mxu2 %v1127_v1 }
 0x15a   : > { %1341 = vmatmul.bf16.gmra.mxu3 %v1252_v2  ;;  %v3977_v2 = vld [vmem:[#allocation11 + $0x38] sm:$0xff] }
 0x15b   : > { %1596 = vmatpush.bf16.msra.mxu1 %v3977_v2 }
 0x15d   : > { %v4525_v3 = vpop.f32.mrf.mxu0 }
 0x165   : > { %v577_v4 = vpop.f32.mrf.mxu1  ;;  %v471_v6 = vpop.f32.mrf.mxu0 }
 0x166   : > { %v603_v5 = vadd.f32 %v577_v4, %v466_v63  ;;  %v3985_v4 = vld [vmem:[#allocation11 + $0x78] sm:$0xff] }
 0x167   : > { %1687 = vmatpush.bf16.msra.mxu2 %v3985_v4  ;;  %v3982_v4 = vld [vmem:[#allocation11 + $0x60] sm:$0xff] }
 0x168   : > { %1456 = vmatmul.bf16.gmra.mxu0 %v1375_v17 }
 0x16c   : > { %v702_v7 = vpop.f32.mrf.mxu2 }
 0x16d   : > { %v728_v8 = vadd.f32 %v702_v7, %v603_v5  ;;  %v827_v9 = vpop.f32.mrf.mxu3  ;;  %v4530_v10 = vpop.f32.mrf.mxu1  ;;  %v3976_v7 = vld [vmem:[#allocation11 + $0x30] sm:$0xff] }
 0x16e   : > { %v4534_v12 = vpop.f32.mrf.mxu0  ;;  %1597 = vmatpush.bf16.msra.mxu1 %v3976_v7  ;;  %v3991_v7 = vld [vmem:[#allocation11 + $0xa8] sm:$0xff] }
 0x16f   : > { %v4532_v11 = vadd.f32 %v827_v9, %v728_v8 }
 0x174   : > { %v4536_v52 = vpop.f32.mrf.mxu2 }
 0x175   : > { %v4538_v55 = vpop.f32.mrf.mxu3  ;;  %v582_v58 = vpop.f32.mrf.mxu1 }
 0x176   : > { %v605_v13 = vadd.f32 %v582_v58, %v471_v6  ;;  %v476_v15 = vpop.f32.mrf.mxu0  ;;  %v3975_v58 = vld [vmem:[#allocation11 + $0x28] sm:$0xff] }
 0x177   : > { %1598 = vmatpush.bf16.msra.mxu1 %v3975_v58 }
 0x178   : > { %1461 = vmatmul.bf16.gmra.mxu0 %v1376_v42 }
 0x17c   : > { %v707_v62 = vpop.f32.mrf.mxu2 }
 0x17d   : > { %v730_v14 = vadd.f32 %v707_v62, %v605_v13  ;;  %v832_v17 = vpop.f32.mrf.mxu3  ;;  %v4543_v16 = vpop.f32.mrf.mxu1  ;;  %v604_v62 = vadd.f32 %v4530_v10, %v4525_v3 }
 0x17e   : > { %v478_v19 = vpop.f32.mrf.mxu0 }
 0x17f   : > { %v4545_v18 = vadd.f32 %v832_v17, %v730_v14 }
 0x184   : > { %v4547_v20 = vpop.f32.mrf.mxu2 }
 0x185   : > { %v4549_v21 = vpop.f32.mrf.mxu3  ;;  %v587_v22 = vpop.f32.mrf.mxu1 }
 0x186   : > { %v607_v23 = vadd.f32 %v587_v22, %v476_v15  ;;  %v481_v25 = vpop.f32.mrf.mxu0 }
 0x188   : > { %1466 = vmatmul.bf16.gmra.mxu0 %v1377_v26  ;;  %v3984_v26 = vld [vmem:[#allocation11 + $0x70] sm:$0xff] }
 0x189   : > { %1688 = vmatpush.bf16.msra.mxu2 %v3984_v26  ;;  %v3980_v26 = vld [vmem:[#allocation11 + $0x50] sm:$0xff] }
 0x18c   : > { %v712_v24 = vpop.f32.mrf.mxu2 }
 0x18d   : > { %v732_v40 = vadd.f32 %v712_v24, %v607_v23  ;;  %v837_v42 = vpop.f32.mrf.mxu3  ;;  %v589_v27 = vpop.f32.mrf.mxu1  ;;  %v729_v23 = vadd.f32 %v4536_v52, %v604_v62  ;;  %v3993_v24 = vld [vmem:[#allocation11 + $0xb8] sm:$0xff] }
 0x18e   : > { %v483_v29 = vpop.f32.mrf.mxu0  ;;  %v608_v30 = vadd.f32 %v589_v27, %v478_v19  ;;  %v3974_v19 = vld [vmem:[#allocation11 + $0x20] sm:$0xff]  ;;  %1784 = vmatpush.bf16.msra.mxu3 %v3993_v24  ;;  %v3992_v27 = vld [vmem:[#allocation11 + $0xb0] sm:$0xff] }
 0x18f   : > { %v4553_v28 = vadd.f32 %v837_v42, %v732_v40  ;;  %1599 = vmatpush.bf16.msra.mxu1 %v3974_v19  ;;  %v3983_v42 = vld [vmem:[#allocation11 + $0x68] sm:$0xff]  ;;  %v3973_v29 = vld [vmem:[#allocation11 + $0x18] sm:$0xff]  ;;  %v854_v3 = vadd.f32 %v4538_v55, %v729_v23 }
 0x190   : > { %1689 = vmatpush.bf16.msra.mxu2 %v3983_v42  ;;  %v3971_v55 = vld [vmem:[#allocation11 + $0x8] sm:$0xff]  ;;  %v4021_v42 = vld [vmem:[#allocation11 + $0x198] sm:$0xff] }
 0x192   : > { %1785 = vmatpush.bf16.msra.mxu3 %v3992_v27 }
 0x193   : > { %1600 = vmatpush.bf16.msra.mxu1 %v3973_v29 }
 0x194   : > { %v714_v31 = vpop.f32.mrf.mxu2  ;;  %1690 = vmatpush.bf16.msra.mxu2 %v3982_v4  ;;  %v3997_v4 = vld [vmem:[#allocation11 + $0xd8] sm:$0xff] }
 0x195   : > { %v733_v32 = vadd.f32 %v714_v31, %v608_v30  ;;  %v839_v33 = vpop.f32.mrf.mxu3  ;;  %v592_v34 = vpop.f32.mrf.mxu1 }
 0x196   : > { %v609_v36 = vadd.f32 %v592_v34, %v481_v25  ;;  %v952_v37 = vpop.f32.mrf.mxu0  ;;  %1786 = vmatpush.bf16.msra.mxu3 %v3991_v7  ;;  %v4017_v7 = vld [vmem:[#allocation11 + $0x178] sm:$0xff] }
 0x197   : > { %v4555_v35 = vadd.f32 %v839_v33, %v733_v32  ;;  %v978_v14 = vadd.f32 %v952_v37, %v4532_v11  ;;  %v3972_v32 = vld [vmem:[#allocation11 + $0x10] sm:$0xff] }
 0x198   : > { %1601 = vmatpush.bf16.msra.mxu1 %v3972_v32 }
 0x19c   : > { %v717_v38 = vpop.f32.mrf.mxu2  ;;  %1602 = vmatpush.bf16.msra.mxu1 %v3971_v55  ;;  %v3986_v55 = vld [vmem:[#allocation11 + $0x80] sm:$0xff] }
 0x19d   : > { %v734_v39 = vadd.f32 %v717_v38, %v609_v36  ;;  %v842_v51 = vpop.f32.mrf.mxu3  ;;  %v594_v41 = vpop.f32.mrf.mxu1  ;;  %v4025_v38 = vld [vmem:[#allocation11 + $0x1b8] sm:$0xff] }
 0x19e   : > { %v954_v44 = vpop.f32.mrf.mxu0  ;;  %2172 = vmatpush.bf16.msrb.mxu0 %v4025_v38  ;;  %v606_v41 = vadd.f32 %v4543_v16, %v4534_v12  ;;  %v3981_v12 = vld [vmem:[#allocation11 + $0x58] sm:$0xff]  ;;  %v3990_v16 = vld [vmem:[#allocation11 + $0xa0] sm:$0xff] }
 0x19f   : > { %v4557_v43 = vadd.f32 %v842_v51, %v734_v39  ;;  %v979_v30 = vadd.f32 %v954_v44, %v854_v3  ;;  %1691 = vmatpush.bf16.msra.mxu2 %v3981_v12  ;;  %1787 = vmatpush.bf16.msra.mxu3 %v3990_v16  ;;  %v3978_v38 = vld [vmem:[#allocation11 + $0x40] sm:$0xff] }
 0x1a3   : > { %1692 = vmatpush.bf16.msra.mxu2 %v3980_v26  ;;  %v4013_v26 = vld [vmem:[#allocation11 + $0x158] sm:$0xff] }
 0x1a4   : > { %v719_v45 = vpop.f32.mrf.mxu2 }
 0x1a5   : > { %v844_v46 = vpop.f32.mrf.mxu3  ;;  %v1077_v47 = vpop.f32.mrf.mxu1 }
 0x1a6   : > { %v4559_v48 = vpop.f32.mrf.mxu0  ;;  %v1103_v25 = vadd.f32 %v1077_v47, %v978_v14  ;;  %v4024_v47 = vld [vmem:[#allocation11 + $0x1b0] sm:$0xff]  ;;  %v4022_v14 = vld [vmem:[#allocation11 + $0x1a0] sm:$0xff] }
 0x1a7   : > { %v980_v44 = vadd.f32 %v4559_v48, %v4545_v18  ;;  %2173 = vmatpush.bf16.msrb.mxu0 %v4024_v47  ;;  %v4023_v18 = vld [vmem:[#allocation11 + $0x1a8] sm:$0xff] }
 0x1ab   : > { %2174 = vmatpush.bf16.msrb.mxu0 %v4023_v18 }
 0x1ac   : > { %v1202_v49 = vpop.f32.mrf.mxu2 }
 0x1ad   : > { %v1327_v50 = vpop.f32.mrf.mxu3  ;;  %v1079_v53 = vpop.f32.mrf.mxu1  ;;  %v1228_v40 = vadd.f32 %v1202_v49, %v1103_v25  ;;  %v3970_v49 = vld [vmem:[#allocation11] sm:$0xff] }
 0x1ae   : > { %v4561_v54 = vpop.f32.mrf.mxu0  ;;  %v1104_v34 = vadd.f32 %v1079_v53, %v979_v30  ;;  %v731_v53 = vadd.f32 %v4547_v20, %v606_v41  ;;  %1603 = vmatpush.bf16.msra.mxu1 %v3970_v49  ;;  %v4000_v30 = vld [vmem:[#allocation11 + $0xf0] sm:$0xff]  ;;  %v3998_v41 = vld [vmem:[#allocation11 + $0xe0] sm:$0xff] }
 0x1af   : > { %v1353_v31 = vadd.f32 %v1327_v50, %v1228_v40  ;;  %2175 = vmatpush.bf16.msrb.mxu0 %v4022_v14  ;;  %v4001_v40 = vld [vmem:[#allocation11 + $0xf8] sm:$0xff] }
 0x1b0   : > { %v856_v48 = vadd.f32 %v4549_v21, %v731_v53 }
 0x1b2   : > { %1881 = vmatpush.bf16.msrb.mxu1 %v4001_v40  ;;  %v4012_v40 = vld [vmem:[#allocation11 + $0x150] sm:$0xff] }
 0x1b3   : > { %2176 = vmatpush.bf16.msrb.mxu0 %v4021_v42 }
 0x1b4   : > { %v1204_v56 = vpop.f32.mrf.mxu2 }
 0x1b5   : > { %v1329_v57 = vpop.f32.mrf.mxu3  ;;  %v4563_v59 = vpop.f32.mrf.mxu1  ;;  %v1229_v37 = vadd.f32 %v1204_v56, %v1104_v34 }
 0x1b6   : > { %v4565_v60 = vpop.f32.mrf.mxu0  ;;  %v1105_v56 = vadd.f32 %v4563_v59, %v980_v44  ;;  %v981_v59 = vadd.f32 %v4561_v54, %v856_v48  ;;  %1882 = vmatpush.bf16.msrb.mxu1 %v4000_v30 }
 0x1b7   : > { %v1354_v45 = vadd.f32 %v1329_v57, %v1229_v37  ;;  %v982_v27 = vadd.f32 %v4565_v60, %v4553_v28  ;;  %v3979_v37 = vld [vmem:[#allocation11 + $0x48] sm:$0xff] }
 0x1b8   : > { %v3987_v28 = vld [vmem:[#allocation11 + $0x88] sm:$0xff]  ;;  %1693 = vmatpush.bf16.msra.mxu2 %v3979_v37 }
 0x1b9   : > { %v3999_v60 = vld [vmem:[#allocation11 + $0xe8] sm:$0xff] }
 0x1ba   : > { %1883 = vmatpush.bf16.msrb.mxu1 %v3999_v60 }
 0x1bc   : > { %v4567_v61 = vpop.f32.mrf.mxu2  ;;  %1694 = vmatpush.bf16.msra.mxu2 %v3978_v38 }
 0x1bd   : > { %v4569_v63 = vpop.f32.mrf.mxu3  ;;  %v4571_v0 = vpop.f32.mrf.mxu1  ;;  %v1230_v58 = vadd.f32 %v4567_v61, %v1105_v56 }
 0x1be   : > { %v4573_v1 = vpop.f32.mrf.mxu0  ;;  %v1106_v61 = vadd.f32 %v4571_v0, %v981_v59  ;;  %1884 = vmatpush.bf16.msrb.mxu1 %v3998_v41  ;;  %v4015_v59 = vld [vmem:[#allocation11 + $0x168] sm:$0xff] }
 0x1bf   : > { %v1355_v62 = vadd.f32 %v4569_v63, %v1230_v58  ;;  %v3989_v63 = vld [vmem:[#allocation11 + $0x98] sm:$0xff]  ;;  %v983_v44 = vadd.f32 %v4573_v1, %v4555_v35  ;;  %v4008_v1 = vld [vmem:[#allocation11 + $0x130] sm:$0xff] }
 0x1c0   : > { %1788 = vmatpush.bf16.msra.mxu3 %v3989_v63  ;;  %v4004_v63 = vld [vmem:[#allocation11 + $0x110] sm:$0xff] }
 0x1c2   : > { %1885 = vmatpush.bf16.msrb.mxu1 %v3997_v4 }
 0x1c4   : > { %v4575_v5 = vpop.f32.mrf.mxu2 }
 0x1c5   : > { %v4577_v6 = vpop.f32.mrf.mxu3  ;;  %v4579_v8 = vpop.f32.mrf.mxu1  ;;  %v1231_v54 = vadd.f32 %v4575_v5, %v1106_v61  ;;  %v3988_v5 = vld [vmem:[#allocation11 + $0x90] sm:$0xff] }
 0x1c6   : > { %v4581_v9 = vpop.f32.mrf.mxu0  ;;  %1789 = vmatpush.bf16.msra.mxu3 %v3988_v5 }
 0x1c7   : > { %v1356_v29 = vadd.f32 %v4577_v6, %v1231_v54  ;;  %v4019_v6 = vld [vmem:[#allocation11 + $0x188] sm:$0xff]  ;;  %v984_v58 = vadd.f32 %v4581_v9, %v4557_v43  ;;  %v4006_v43 = vld [vmem:[#allocation11 + $0x120] sm:$0xff]  ;;  %v4033_v54 = vld [vmem:[#allocation11 + $0x1f8] sm:$0xff] }
 0x1c8   : > { %v4014_v9 = vld [vmem:[#allocation11 + $0x160] sm:$0xff] }
 0x1ca   : > { %1790 = vmatpush.bf16.msra.mxu3 %v3987_v28 }
 0x1cc   : > { %v4583_v13 = vpop.f32.mrf.mxu2 }
 0x1cd   : > { %v4585_v15 = vpop.f32.mrf.mxu3  ;;  %v4590_v17 = vpop.f32.mrf.mxu1 }
 0x1ce   : > { %v969_v22 = vpop.f32.mrf.mxu0  ;;  %1791 = vmatpush.bf16.msra.mxu3 %v3986_v55 }
 0x1cf   : > { %v4618_v22 = vld [vmem:[%s4705_s2] ss:$0 sm:$0xff] }
 0x1d2   : > { %2075 = vmatpush.bf16.msrb.mxu3 %v4017_v7 }
 0x1d4   : > { %v4594_v10 = vpop.f32.mrf.mxu2 }
 0x1d5   : > { %v4596_v11 = vpop.f32.mrf.mxu3  ;;  %v4598_v52 = vpop.f32.mrf.mxu1 }
 0x1d6   : > { %v1452_v33 = vpop.f32.mrf.mxu0  ;;  %v1109_v18 = vadd.f32 %v4598_v52, %v984_v58 }
 0x1d7   : > { %v1478_v36 = vadd.f32 %v1452_v33, %v1353_v31  ;;  %v4020_v31 = vld [vmem:[#allocation11 + $0x190] sm:$0xff]  ;;  %v1107_v33 = vadd.f32 %v4579_v8, %v982_v27  ;;  %v4018_v8 = vld [vmem:[#allocation11 + $0x180] sm:$0xff]  ;;  %v4003_v27 = vld [vmem:[#allocation11 + $0x108] sm:$0xff] }
 0x1d8   : > { %2177 = vmatpush.bf16.msrb.mxu0 %v4020_v31  ;;  %v4031_v31 = vld [vmem:[#allocation11 + $0x1e8] sm:$0xff] }
 0x1d9   : > { %1485 = vst [vmem:[#allocation3] sm:$0xff] %v1478_v36  ;;  %v1232_v36 = vadd.f32 %v4583_v13, %v1107_v33  ;;  %v1108_v13 = vadd.f32 %v4590_v17, %v983_v44  ;;  %v3996_v17 = vld [vmem:[#allocation11 + $0xd0] sm:$0xff]  ;;  %v4002_v33 = vld [vmem:[#allocation11 + $0x100] sm:$0xff] }
 0x1da   : > { %1886 = vmatpush.bf16.msrb.mxu1 %v3996_v17 }
 0x1db   : > { %v1233_v53 = vadd.f32 %v4594_v10, %v1108_v13 }
 0x1dc   : > { %v4600_v39 = vpop.f32.mrf.mxu2  ;;  %2178 = vmatpush.bf16.msrb.mxu0 %v4019_v6 }
 0x1dd   : > { %v4602_v51 = vpop.f32.mrf.mxu3  ;;  %v1094_v46 = vpop.f32.mrf.mxu1  ;;  %v1358_v12 = vadd.f32 %v4596_v11, %v1233_v53  ;;  %v1234_v14 = vadd.f32 %v4600_v39, %v1109_v18  ;;  %v3994_v11 = vld [vmem:[#allocation11 + $0xc0] sm:$0xff]  ;;  %v4005_v39 = vld [vmem:[#allocation11 + $0x118] sm:$0xff] }
 0x1de   : > { %v1454_v50 = vpop.f32.mrf.mxu0 }
 0x1df   : > { %v1479_v2 = vadd.f32 %v1454_v50, %v1354_v45  ;;  %v1357_v45 = vadd.f32 %v4585_v15, %v1232_v36  ;;  %v4016_v15 = vld [vmem:[#allocation11 + $0x170] sm:$0xff]  ;;  %v1359_v52 = vadd.f32 %v4602_v51, %v1234_v14 }
 0x1e0   : > { %2179 = vmatpush.bf16.msrb.mxu0 %v4018_v8  ;;  %2076 = vmatpush.bf16.msrb.mxu3 %v4016_v15  ;;  %v4032_v51 = vld [vmem:[#allocation11 + $0x1f0] sm:$0xff] }
 0x1e1   : > { %1486 = vst [vmem:[#allocation3 + $0x8] sm:$0xff] %v1479_v2  ;;  %v4009_v2 = vld [vmem:[#allocation11 + $0x138] sm:$0xff] }
 0x1e2   : > { %1978 = vmatpush.bf16.msrb.mxu2 %v4009_v2 }
 0x1e4   : > { %v1219_v57 = vpop.f32.mrf.mxu2  ;;  %2077 = vmatpush.bf16.msrb.mxu3 %v4015_v59 }
 0x1e5   : > { %v1344_v20 = vpop.f32.mrf.mxu3 }
 0x1e6   : > { %v1457_v19 = vpop.f32.mrf.mxu0  ;;  %1979 = vmatpush.bf16.msrb.mxu2 %v4008_v1  ;;  %v4007_v20 = vld [vmem:[#allocation11 + $0x128] sm:$0xff]  ;;  %v4026_v1 = vld [vmem:[#allocation11 + $0x1c0] sm:$0xff] }
 0x1e7   : > { %v1480_v23 = vadd.f32 %v1457_v19, %v1355_v62  ;;  %v3995_v62 = vld [vmem:[#allocation11 + $0xc8] sm:$0xff] }
 0x1e8   : > { %v1493_v21 = vld [vmem:[#allocation3] ss:$2 sm:$0xff]  ;;  %v1501_v25 = vld [vmem:[#allocation3 + $0x1] ss:$2 sm:$0xff]  ;;  %1887 = vmatpush.bf16.msrb.mxu1 %v3995_v62  ;;  %2078 = vmatpush.bf16.msrb.mxu3 %v4014_v9 }
 0x1e9   : > { %v1508_v24 = vmax.f32 %v1493_v21, %v1501_v25  ;;  %1487 = vst [vmem:[#allocation3 + $0x10] sm:$0xff] %v1480_v23 }
 0x1ea   : > { %1980 = vmatpush.bf16.msrb.mxu2 %v4007_v20 }
 0x1eb   : > { %v4622_v0 = vadd.f32 %v4618_v22, %v1508_v24 }
 0x1ec   : > { %1888 = vmatpush.bf16.msrb.mxu1 %v3994_v11  ;;  %2079 = vmatpush.bf16.msrb.mxu3 %v4013_v26 }
 0x1ed   : > { %v1519_v3 = vmax.f32 %v4622_v0, 0.0 }
 0x1ee   : > { %v1459_v32 = vpop.f32.mrf.mxu0  ;;  %1981 = vmatpush.bf16.msrb.mxu2 %v4006_v43 }
 0x1ef   : > { %1523 = vst [vmem:[#allocation4] sm:$0xff] %v1519_v3  ;;  %v1481_v34 = vadd.f32 %v1459_v32, %v1356_v29  ;;  %v4011_v29 = vld [vmem:[#allocation11 + $0x148] sm:$0xff] }
 0x1f0   : > { %2080 = vmatpush.bf16.msrb.mxu3 %v4012_v40  ;;  %v4049_v40 = vld [vmem:[#allocation13 + $0x78] sm:$0xff] }
 0x1f1   : > { %1488 = vst [vmem:[#allocation3 + $0x18] sm:$0xff] %v1481_v34  ;;  %v4010_v34 = vld [vmem:[#allocation11 + $0x140] sm:$0xff] }
 0x1f2   : > { %1982 = vmatpush.bf16.msrb.mxu2 %v4005_v39 }
 0x1f4   : > { %2081 = vmatpush.bf16.msrb.mxu3 %v4011_v29 }
 0x1f6   : > { %v1462_v46 = vpop.f32.mrf.mxu0  ;;  %1983 = vmatpush.bf16.msrb.mxu2 %v4004_v63  ;;  %v4041_v63 = vld [vmem:[#allocation13 + $0x38] sm:$0xff] }
 0x1f7   : > { %v1482_v47 = vadd.f32 %v1462_v46, %v1357_v45  ;;  %v4030_v46 = vld [vmem:[#allocation11 + $0x1e0] sm:$0xff] }
 0x1f8   : > { %v1495_v49 = vld [vmem:[#allocation3 + $0x10] ss:$2 sm:$0xff]  ;;  %v1503_v50 = vld [vmem:[#allocation3 + $0x11] ss:$2 sm:$0xff]  ;;  %2082 = vmatpush.bf16.msrb.mxu3 %v4010_v34  ;;  %v4038_v34 = vld [vmem:[#allocation13 + $0x20] sm:$0xff] }
 0x1f9   : > { %v1509_v56 = vmax.f32 %v1495_v49, %v1503_v50  ;;  %1489 = vst [vmem:[#allocation3 + $0x20] sm:$0xff] %v1482_v47  ;;  %v4028_v47 = vld [vmem:[#allocation11 + $0x1d0] sm:$0xff]  ;;  %v4027_v49 = vld [vmem:[#allocation11 + $0x1c8] sm:$0xff] }
 0x1fa   : > { %1984 = vmatpush.bf16.msrb.mxu2 %v4003_v27 }
 0x1fb   : > { %v1516_v35 = vadd.f32 %v4618_v22, %v1509_v56 }
 0x1fd   : > { %v1520_v16 = vmax.f32 %v1516_v35, 0.0 }
 0x1fe   : > { %v1464_v10 = vpop.f32.mrf.mxu0  ;;  %1985 = vmatpush.bf16.msrb.mxu2 %v4002_v33  ;;  %v4065_v33 = vld [vmem:[#allocation13 + $0xf8] sm:$0xff] }
 0x1ff   : > { %1524 = vst [vmem:[#allocation4 + $0x8] sm:$0xff] %v1520_v16  ;;  %v1483_v48 = vadd.f32 %v1464_v10, %v1358_v12  ;;  %v1530_v57 = vpack.c.bf16 %v1520_v16, %v1519_v3 }
 0x201   : > { %1490 = vst [vmem:[#allocation3 + $0x28] sm:$0xff] %v1483_v48  ;;  %1604 = vmatmul.bf16.vlgmr.msra.gmra.mxu1 %v1530_v57 }
 0x202   : > { %2269 = vmatpush.bf16.msra.mxu1 %v4033_v54 }
 0x206   : > { %v1467_v19 = vpop.f32.mrf.mxu0  ;;  %2270 = vmatpush.bf16.msra.mxu1 %v4032_v51  ;;  %v1617_v36 = vld [vmem:[#allocation4 + $0x1] sm:$0xff] }
 0x207   : > { %v1484_v61 = vadd.f32 %v1467_v19, %v1359_v52  ;;  %v1714_v37 = vld [vmem:[#allocation4 + $0x2] sm:$0xff] }
 0x208   : > { %v1497_v23 = vld [vmem:[#allocation3 + $0x20] ss:$2 sm:$0xff]  ;;  %v1505_v21 = vld [vmem:[#allocation3 + $0x21] ss:$2 sm:$0xff]  ;;  %v4040_v51 = vld [vmem:[#allocation13 + $0x30] sm:$0xff] }
 0x209   : > { %1491 = vst [vmem:[#allocation3 + $0x30] sm:$0xff] %v1484_v61  ;;  %v1510_v25 = vmax.f32 %v1497_v23, %v1505_v21  ;;  %v2102_v44 = vld [vmem:[#allocation4 + $0x6] sm:$0xff] }
 0x20a   : > { %2271 = vmatpush.bf16.msra.mxu1 %v4031_v31  ;;  %v1811_v4 = vld [vmem:[#allocation4 + $0x3] sm:$0xff] }
 0x20b   : > { %v1517_v24 = vadd.f32 %v4618_v22, %v1510_v25  ;;  %v1908_v10 = vld [vmem:[#allocation4 + $0x4] sm:$0xff] }
 0x20c   : > { %v2005_v57 = vld [vmem:[#allocation4 + $0x5] sm:$0xff] }
 0x20d   : > { %v1521_v42 = vmax.f32 %v1517_v24, 0.0  ;;  %v2199_v43 = vld [vmem:[#allocation4 + $0x7] sm:$0xff] }
 0x20e   : > { %v1469_v0 = vpop.f32.mrf.mxu0  ;;  %2272 = vmatpush.bf16.msra.mxu1 %v4030_v46  ;;  %v4055_v46 = vld [vmem:[#allocation13 + $0xa8] sm:$0xff] }
 0x20f   : > { %1525 = vst [vmem:[#allocation4 + $0x10] sm:$0xff] %v1521_v42  ;;  %v4048_v0 = vld [vmem:[#allocation13 + $0x70] sm:$0xff] }
 0x210   : > { %v1499_v3 = vld [vmem:[#allocation3 + $0x30] ss:$2 sm:$0xf]  ;;  %v1507_v5 = vld [vmem:[#allocation3 + $0x31] ss:$2 sm:$0xf] }
 0x211   : > { %v1511_v30 = vmax.f32 %v1499_v3, %v1507_v5  ;;  %v4039_v5 = vld [vmem:[#allocation13 + $0x28] sm:$0xff] }
 0x213   : > { %v1518_v32 = vadd.f32 %v4618_v22, %v1511_v30  ;;  %v4029_v22 = vld [vmem:[#allocation11 + $0x1d8] sm:$0xff]  ;;  %v4047_v30 = vld [vmem:[#allocation13 + $0x68] sm:$0xff] }
 0x214   : > { %2273 = vmatpush.bf16.msra.mxu1 %v4029_v22  ;;  %v4036_v22 = vld [vmem:[#allocation13 + $0x10] sm:$0xff] }
 0x215   : > { %v1522_v28 = vmax.f32 %v1518_v32, 0.0  ;;  %v4057_v32 = vld [vmem:[#allocation13 + $0xb8] sm:$0xff] }
 0x216   : > { %v1529_v60 = vld [vmem:[#allocation4 + $0x10] sm:$0x1f]  ;;  %2545 = vmatpush.bf16.msra.mxu0 %v4057_v32 }
 0x217   : > { %v1618_v6 = vld [vmem:[#allocation4 + $0x9] sm:$0xff]  ;;  %v1531_v55 = vpack.c.bf16 %v1529_v60, %v1529_v60  ;;  %1526 = vst [vmem:[#allocation4 + $0x18] sm:$0xf] %v1522_v28  ;;  %v1619_v50 = vld [vmem:[#allocation4 + $0x11] sm:$0x1f] }
 0x218   : > { %v1715_v38 = vld [vmem:[#allocation4 + $0xa] sm:$0xff]  ;;  %v1620_v41 = vpack.c.bf16 %v1618_v6, %v1617_v36  ;;  %2274 = vmatpush.bf16.msra.mxu1 %v4028_v47  ;;  %v1716_v56 = vld [vmem:[#allocation4 + $0x12] sm:$0x1f]  ;;  %v1621_v7 = vpack.c.bf16 %v1619_v50, %v1619_v50  ;;  %v4044_v47 = vld [vmem:[#allocation13 + $0x50] sm:$0xff] }
 0x219   : > { %v1717_v8 = vpack.c.bf16 %v1715_v38, %v1714_v37  ;;  %v2103_v45 = vld [vmem:[#allocation4 + $0xe] sm:$0xff]  ;;  %1609 = vmatmul.bf16.gmra.mxu1 %v1531_v55  ;;  %v1718_v15 = vpack.c.bf16 %v1716_v56, %v1716_v56  ;;  %v4056_v55 = vld [vmem:[#allocation13 + $0xb0] sm:$0xff] }
 0x21a   : > { %v2105_v13 = vpack.c.bf16 %v2103_v45, %v2102_v44  ;;  %1695 = vmatmul.bf16.vlgmr.msra.gmra.mxu2 %v1620_v41  ;;  %v1812_v53 = vld [vmem:[#allocation4 + $0xb] sm:$0xff]  ;;  %v1813_v58 = vld [vmem:[#allocation4 + $0x13] sm:$0x1f]  ;;  %v4064_v41 = vld [vmem:[#allocation13 + $0xf0] sm:$0xff]  ;;  %2546 = vmatpush.bf16.msra.mxu0 %v4056_v55 }
 0x21b   : > { %1792 = vmatmul.bf16.vlgmr.msra.gmra.mxu3 %v1717_v8  ;;  %v1814_v35 = vpack.c.bf16 %v1812_v53, %v1811_v4  ;;  %v1909_v12 = vld [vmem:[#allocation4 + $0xc] sm:$0xff]  ;;  %v1815_v18 = vpack.c.bf16 %v1813_v58, %v1813_v58  ;;  %2381 = vmatpush.bf16.msra.mxu2 %v4041_v63  ;;  %v4037_v8 = vld [vmem:[#allocation13 + $0x18] sm:$0xff]  ;;  %v4071_v63 = vld [vmem:[#allocation13 + $0x128] sm:$0xff] }
 0x21c   : > { %2180 = vmatmul.bf16.vlgmr.msrb.gmra.mxu0 %v2105_v13  ;;  %2275 = vmatpush.bf16.msra.mxu1 %v4027_v49  ;;  %v2006_v16 = vld [vmem:[#allocation4 + $0xd] sm:$0xff]  ;;  %v1911_v48 = vpack.c.bf16 %v1909_v12, %v1908_v10  ;;  %v4045_v45 = vld [vmem:[#allocation13 + $0x58] sm:$0xff] }
 0x21d   : > { %v2008_v20 = vpack.c.bf16 %v2006_v16, %v2005_v57  ;;  %v2200_v62 = vld [vmem:[#allocation4 + $0xf] sm:$0xff]  ;;  %2462 = vmatpush.bf16.msra.mxu3 %v4049_v40  ;;  %v4053_v58 = vld [vmem:[#allocation13 + $0x98] sm:$0xff] }
 0x21e   : > { %v2104_v2 = vld [vmem:[#allocation4 + $0x16] sm:$0x1f]  ;;  %v2202_v11 = vpack.c.bf16 %v2200_v62, %v2199_v43  ;;  %v4046_v36 = vld [vmem:[#allocation13 + $0x60] sm:$0xff]  ;;  %2547 = vmatpush.bf16.msra.mxu0 %v4055_v46  ;;  %v4061_v12 = vld [vmem:[#allocation13 + $0xd8] sm:$0xff] }
 0x21f   : > { %v2106_v17 = vpack.c.bf16 %v2104_v2, %v2104_v2  ;;  %v1910_v59 = vld [vmem:[#allocation4 + $0x14] sm:$0x1f]  ;;  %2382 = vmatpush.bf16.msra.mxu2 %v4040_v51  ;;  %v4054_v4 = vld [vmem:[#allocation13 + $0xa0] sm:$0xff]  ;;  %v4081_v57 = vld [vmem:[#allocation13 + $0x178] sm:$0xff] }
 0x220   : > { %2276 = vmatpush.bf16.msra.mxu1 %v4026_v1  ;;  %v2007_v14 = vld [vmem:[#allocation4 + $0x15] sm:$0x1f]  ;;  %v1912_v9 = vpack.c.bf16 %v1910_v59, %v1910_v59  ;;  %v4034_v16 = vld [vmem:[#allocation13] sm:$0xff] }
 0x221   : > { %v2009_v52 = vpack.c.bf16 %v2007_v14, %v2007_v14  ;;  %v2201_v19 = vld [vmem:[#allocation4 + $0x17] sm:$0x1f]  ;;  %2463 = vmatpush.bf16.msra.mxu3 %v4048_v0 }
 0x222   : > { %v2203_v61 = vpack.c.bf16 %v2201_v19, %v2201_v19  ;;  %v4063_v13 = vld [vmem:[#allocation13 + $0xe8] sm:$0xff]  ;;  %2548 = vmatpush.bf16.msra.mxu0 %v4054_v4  ;;  %v4080_v19 = vld [vmem:[#allocation13 + $0x170] sm:$0xff] }
 0x223   : > { %2383 = vmatpush.bf16.msra.mxu2 %v4039_v5  ;;  %v4035_v1 = vld [vmem:[#allocation13 + $0x8] sm:$0xff] }
 0x224   : > { %v4079_v40 = vld [vmem:[#allocation13 + $0x168] sm:$0xff] }
 0x225   : > { %2464 = vmatpush.bf16.msra.mxu3 %v4047_v30  ;;  %v4058_v30 = vld [vmem:[#allocation13 + $0xc0] sm:$0xff]  ;;  %v4087_v46 = vld [vmem:[#allocation13 + $0x1a8] sm:$0xff] }
 0x226   : > { %2549 = vmatpush.bf16.msra.mxu0 %v4053_v58  ;;  %v4066_v58 = vld [vmem:[#allocation13 + $0x100] sm:$0xff] }
 0x227   : > { %2384 = vmatpush.bf16.msra.mxu2 %v4038_v34  ;;  %v4097_v34 = vld [vmem:[#allocation13 + $0x1f8] sm:$0xff] }
 0x229   : > { %1889 = vmatmul.bf16.vlgmr.msrb.gmra.mxu1 %v1814_v35  ;;  %2465 = vmatpush.bf16.msra.mxu3 %v4046_v36  ;;  %v4070_v36 = vld [vmem:[#allocation13 + $0x120] sm:$0xff] }
 0x22a   : > { %1700 = vmatmul.bf16.gmra.mxu2 %v1621_v7  ;;  %2628 = vmatpush.bf16.msrb.mxu1 %v4065_v33  ;;  %v4062_v7 = vld [vmem:[#allocation13 + $0xe0] sm:$0xff]  ;;  %v4089_v33 = vld [vmem:[#allocation13 + $0x1b8] sm:$0xff] }
 0x22b   : > { %1797 = vmatmul.bf16.gmra.mxu3 %v1718_v15  ;;  %2385 = vmatpush.bf16.msra.mxu2 %v4037_v8  ;;  %v4043_v15 = vld [vmem:[#allocation13 + $0x48] sm:$0xff] }
 0x22c   : > { %2185 = vmatmul.bf16.gmra.mxu0 %v2106_v17 }
 0x22d   : > { %2466 = vmatpush.bf16.msra.mxu3 %v4045_v45 }
 0x22e   : > { %2629 = vmatpush.bf16.msrb.mxu1 %v4064_v41  ;;  %v4077_v41 = vld [vmem:[#allocation13 + $0x158] sm:$0xff] }
 0x22f   : > { %2386 = vmatpush.bf16.msra.mxu2 %v4036_v22 }
 0x231   : > { %2467 = vmatpush.bf16.msra.mxu3 %v4044_v47 }
 0x232   : > { %2630 = vmatpush.bf16.msrb.mxu1 %v4063_v13  ;;  %v4095_v13 = vld [vmem:[#allocation13 + $0x1e8] sm:$0xff] }
 0x233   : > { %2387 = vmatpush.bf16.msra.mxu2 %v4035_v1  ;;  %v4093_v1 = vld [vmem:[#allocation13 + $0x1d8] sm:$0xff] }
 0x235   : > { %2468 = vmatpush.bf16.msra.mxu3 %v4043_v15 }
 0x236   : > { %2631 = vmatpush.bf16.msrb.mxu1 %v4062_v7 }
 0x237   : > { %2388 = vmatpush.bf16.msra.mxu2 %v4034_v16 }
 0x239   : > { %1894 = vmatmul.bf16.gmra.mxu1 %v1815_v18  ;;  %v4042_v18 = vld [vmem:[#allocation13 + $0x40] sm:$0xff] }
 0x23a   : > { %1986 = vmatmul.bf16.vlgmr.msrb.gmra.mxu2 %v1911_v48  ;;  %v4073_v48 = vld [vmem:[#allocation13 + $0x138] sm:$0xff]  ;;  %2632 = vmatpush.bf16.msrb.mxu1 %v4061_v12  ;;  %v4074_v12 = vld [vmem:[#allocation13 + $0x140] sm:$0xff] }
 0x23b   : > { %2083 = vmatmul.bf16.vlgmr.msrb.gmra.mxu3 %v2008_v20  ;;  %2711 = vmatpush.bf16.msrb.mxu2 %v4073_v48 }
 0x23c   : > { %2469 = vmatpush.bf16.msra.mxu3 %v4042_v18 }
 0x240   : > { %2794 = vmatpush.bf16.msrb.mxu3 %v4081_v57 }
 0x244   : > { %2795 = vmatpush.bf16.msrb.mxu3 %v4080_v19 }
 0x248   : > { %2796 = vmatpush.bf16.msrb.mxu3 %v4079_v40 }
 0x249   : > { %2277 = vmatmul.bf16.vlgmr.msra.gmra.mxu1 %v2202_v11  ;;  %v4060_v11 = vld [vmem:[#allocation13 + $0xd0] sm:$0xff] }
 0x24a   : > { %1991 = vmatmul.bf16.gmra.mxu2 %v1912_v9  ;;  %v4052_v9 = vld [vmem:[#allocation13 + $0x90] sm:$0xff]  ;;  %2633 = vmatpush.bf16.msrb.mxu1 %v4060_v11 }
 0x24b   : > { %2088 = vmatmul.bf16.gmra.mxu3 %v2009_v52  ;;  %v4072_v52 = vld [vmem:[#allocation13 + $0x130] sm:$0xff]  ;;  %2550 = vmatpush.bf16.msra.mxu0 %v4052_v9  ;;  %v4091_v9 = vld [vmem:[#allocation13 + $0x1c8] sm:$0xff] }
 0x24c   : > { %2712 = vmatpush.bf16.msrb.mxu2 %v4072_v52 }
 0x250   : > { %2713 = vmatpush.bf16.msrb.mxu2 %v4071_v63 }
 0x254   : > { %2714 = vmatpush.bf16.msrb.mxu2 %v4070_v36 }
 0x259   : > { %2282 = vmatmul.bf16.gmra.mxu1 %v2203_v61 }
 0x27e   : > { %v1605_v23 = vpop.f32.mrf.mxu1 }
 0x286   : > { %v4644_v21 = vpop.f32.mrf.mxu1 }
 0x296   : > { %v1610_v25 = vpop.f32.mrf.mxu1 }
 0x297   : > { %1616 = vst [vmem:[#allocation5 + $0x10] sm:$0x1f] %v1610_v25 }
 0x299   : > { %v4646_v39 = vpop.f32.mrf.mxu0 }
 0x29d   : > { %v1696_v26 = vpop.f32.mrf.mxu2 }
 0x29e   : > { %v1793_v54 = vpop.f32.mrf.mxu3  ;;  %v1612_v24 = vpop.f32.mrf.mxu1  ;;  %v1707_v28 = vld [vmem:[#allocation5 + $0x10] sm:$0x1f]  ;;  %v1708_v50 = vadd.f32 %v1696_v26, %v1605_v23 }
 0x2a0   : > { %v1805_v17 = vadd.f32 %v1793_v54, %v1708_v50  ;;  %v4051_v54 = vld [vmem:[#allocation13 + $0x88] sm:$0xff]  ;;  %v4076_v50 = vld [vmem:[#allocation13 + $0x150] sm:$0xff] }
 0x2a1   : > { %v4648_v42 = vpop.f32.mrf.mxu0  ;;  %2551 = vmatpush.bf16.msra.mxu0 %v4051_v54 }
 0x2a5   : > { %v4650_v27 = vpop.f32.mrf.mxu2 }
 0x2a6   : > { %v4652_v29 = vpop.f32.mrf.mxu3  ;;  %v1890_v3 = vpop.f32.mrf.mxu1  ;;  %v1709_v59 = vadd.f32 %v4650_v27, %v4644_v21  ;;  %v4059_v21 = vld [vmem:[#allocation13 + $0xc8] sm:$0xff] }
 0x2a7   : > { %v1902_v10 = vadd.f32 %v1890_v3, %v1805_v17  ;;  %2634 = vmatpush.bf16.msrb.mxu1 %v4059_v21 }
 0x2a8   : > { %v1806_v23 = vadd.f32 %v4652_v29, %v1709_v59  ;;  %v4050_v29 = vld [vmem:[#allocation13 + $0x80] sm:$0xff]  ;;  %v4092_v59 = vld [vmem:[#allocation13 + $0x1d0] sm:$0xff] }
 0x2a9   : > { %v4654_v31 = vpop.f32.mrf.mxu0  ;;  %2552 = vmatpush.bf16.msra.mxu0 %v4050_v29 }
 0x2ab   : > { %2635 = vmatpush.bf16.msrb.mxu1 %v4058_v30 }
 0x2ad   : > { %v1701_v37 = vpop.f32.mrf.mxu2  ;;  %2877 = vmatpush.bf16.msrb.mxu0 %v4089_v33 }
 0x2ae   : > { %v1710_v60 = vadd.f32 %v1707_v28, %v1701_v37  ;;  %v1798_v6 = vpop.f32.mrf.mxu3  ;;  %v4656_v38 = vpop.f32.mrf.mxu1  ;;  %v4078_v37 = vld [vmem:[#allocation13 + $0x160] sm:$0xff] }
 0x2af   : > { %v1903_v24 = vadd.f32 %v4656_v38, %v1806_v23  ;;  %2960 = vmatpush.bf16.msra.mxu1 %v4097_v34  ;;  %2797 = vmatpush.bf16.msrb.mxu3 %v4078_v37  ;;  %v4090_v23 = vld [vmem:[#allocation13 + $0x1c0] sm:$0xff] }
 0x2b0   : > { %1713 = vst [vmem:[#allocation5 + $0x10] sm:$0x1f] %v1710_v60  ;;  %v4088_v60 = vld [vmem:[#allocation13 + $0x1b0] sm:$0xff] }
 0x2b1   : > { %v2188_v44 = vpop.f32.mrf.mxu0  ;;  %2878 = vmatpush.bf16.msrb.mxu0 %v4088_v60 }
 0x2b3   : > { %2798 = vmatpush.bf16.msrb.mxu3 %v4077_v41 }
 0x2b5   : > { %v1703_v49 = vpop.f32.mrf.mxu2  ;;  %2879 = vmatpush.bf16.msrb.mxu0 %v4087_v46 }
 0x2b6   : > { %v1800_v53 = vpop.f32.mrf.mxu3  ;;  %v1895_v2 = vpop.f32.mrf.mxu1  ;;  %v4068_v49 = vld [vmem:[#allocation13 + $0x110] sm:$0xff] }
 0x2b7   : > { %v1804_v56 = vld [vmem:[#allocation5 + $0x10] sm:$0x1f]  ;;  %2799 = vmatpush.bf16.msrb.mxu3 %v4076_v50 }
 0x2b8   : > { %v1807_v35 = vadd.f32 %v1804_v56, %v1798_v6  ;;  %v4069_v6 = vld [vmem:[#allocation13 + $0x118] sm:$0xff]  ;;  %v4086_v53 = vld [vmem:[#allocation13 + $0x1a0] sm:$0xff] }
 0x2b9   : > { %2715 = vmatpush.bf16.msrb.mxu2 %v4069_v6  ;;  %v4094_v56 = vld [vmem:[#allocation13 + $0x1e0] sm:$0xff]  ;;  %2880 = vmatpush.bf16.msrb.mxu0 %v4086_v53 }
 0x2ba   : > { %1810 = vst [vmem:[#allocation5 + $0x10] sm:$0x1f] %v1807_v35  ;;  %v4085_v35 = vld [vmem:[#allocation13 + $0x198] sm:$0xff] }
 0x2bd   : > { %v1987_v20 = vpop.f32.mrf.mxu2  ;;  %2716 = vmatpush.bf16.msrb.mxu2 %v4068_v49  ;;  %2881 = vmatpush.bf16.msrb.mxu0 %v4085_v35 }
 0x2be   : > { %v1999_v62 = vadd.f32 %v1987_v20, %v1902_v10  ;;  %v2084_v14 = vpop.f32.mrf.mxu3  ;;  %v1897_v43 = vpop.f32.mrf.mxu1  ;;  %v4171_v10 = vld [vmem:[%s4707_s4] ss:$0 sm:$0xff]  ;;  %v4084_v20 = vld [vmem:[#allocation13 + $0x190] sm:$0xff] }
 0x2bf   : > { %v4083_v43 = vld [vmem:[#allocation13 + $0x188] sm:$0xff] }
 0x2c0   : > { %v2096_v26 = vadd.f32 %v2084_v14, %v1999_v62 }
 0x2c1   : > { %v1901_v61 = vld [vmem:[#allocation5 + $0x10] sm:$0x1f]  ;;  %2882 = vmatpush.bf16.msrb.mxu0 %v4084_v20  ;;  %v2976_v20 = vld [vmem:[%s4709_s6] sm:$0x1] }
 0x2c2   : > { %v1904_v25 = vadd.f32 %v1901_v61, %v1895_v2  ;;  %v2193_v3 = vadd.f32 %v4646_v39, %v2096_v26  ;;  %v4096_v39 = vld [vmem:[#allocation13 + $0x1f0] sm:$0xff]  ;;  %v4067_v2 = vld [vmem:[#allocation13 + $0x108] sm:$0xff]  ;;  %v4082_v61 = vld [vmem:[#allocation13 + $0x180] sm:$0xff] }
 0x2c3   : > { %2961 = vmatpush.bf16.msra.mxu1 %v4096_v39  ;;  %2717 = vmatpush.bf16.msrb.mxu2 %v4067_v2 }
 0x2c4   : > { %1907 = vst [vmem:[#allocation5 + $0x10] sm:$0x1f] %v1904_v25 }
 0x2c5   : > { %v1989_v51 = vpop.f32.mrf.mxu2  ;;  %2883 = vmatpush.bf16.msrb.mxu0 %v4083_v43 }
 0x2c6   : > { %v2000_v0 = vadd.f32 %v1989_v51, %v1903_v24  ;;  %v2086_v27 = vpop.f32.mrf.mxu3  ;;  %v2278_v5 = vpop.f32.mrf.mxu1 }
 0x2c7   : > { %v2290_v32 = vadd.f32 %v2278_v5, %v2193_v3  ;;  %2962 = vmatpush.bf16.msra.mxu1 %v4095_v13  ;;  %2718 = vmatpush.bf16.msrb.mxu2 %v4066_v58 }
 0x2c8   : > { %v2097_v28 = vadd.f32 %v2086_v27, %v2000_v0 }
 0x2c9   : > { %2293 = vst [vmem:[#allocation5] sm:$0xff] %v2290_v32  ;;  %2884 = vmatpush.bf16.msrb.mxu0 %v4082_v61 }
 0x2ca   : > { %v2194_v45 = vadd.f32 %v4648_v42, %v2097_v28  ;;  %v4075_v42 = vld [vmem:[#allocation13 + $0x148] sm:$0xff] }
 0x2cb   : > { %v1998_v55 = vld [vmem:[#allocation5 + $0x10] sm:$0x1f]  ;;  %2963 = vmatpush.bf16.msra.mxu1 %v4094_v56  ;;  %2800 = vmatpush.bf16.msrb.mxu3 %v4075_v42 }
 0x2cd   : > { %v1992_v38 = vpop.f32.mrf.mxu2 }
 0x2ce   : > { %v2001_v8 = vadd.f32 %v1998_v55, %v1992_v38  ;;  %v2089_v44 = vpop.f32.mrf.mxu3  ;;  %v2280_v22 = vpop.f32.mrf.mxu1 }
 0x2cf   : > { %v2291_v47 = vadd.f32 %v2280_v22, %v2194_v45  ;;  %2964 = vmatpush.bf16.msra.mxu1 %v4093_v1  ;;  %2801 = vmatpush.bf16.msrb.mxu3 %v4074_v12 }
 0x2d0   : > { %2004 = vst [vmem:[#allocation5 + $0x10] sm:$0x1f] %v2001_v8 }
 0x2d1   : > { %2294 = vst [vmem:[#allocation5 + $0x8] sm:$0xff] %v2291_v47 }
 0x2d3   : > { %2965 = vmatpush.bf16.msra.mxu1 %v4092_v59 }
 0x2d5   : > { %v1994_v4 = vpop.f32.mrf.mxu2 }
 0x2d6   : > { %v2091_v7 = vpop.f32.mrf.mxu3  ;;  %v2283_v17 = vpop.f32.mrf.mxu1 }
 0x2d7   : > { %v2095_v15 = vld [vmem:[#allocation5 + $0x10] sm:$0x1f]  ;;  %2966 = vmatpush.bf16.msra.mxu1 %v4091_v9 }
 0x2d8   : > { %v2098_v16 = vadd.f32 %v2095_v15, %v2089_v44  ;;  %v2297_v18 = vld [vmem:[#allocation5] ss:$2 sm:$0xff]  ;;  %v2301_v48 = vld [vmem:[#allocation5 + $0x1] ss:$2 sm:$0xff] }
 0x2d9   : > { %v2304_v57 = vmax.f32 %v2297_v18, %v2301_v48 }
 0x2da   : > { %2101 = vst [vmem:[#allocation5 + $0x10] sm:$0x1f] %v2098_v16 }
 0x2db   : > { %v2309_v62 = vadd.f32 %v4171_v10, %v2304_v57  ;;  %2967 = vmatpush.bf16.msra.mxu1 %v4090_v23 }
 0x2dd   : > { %v2311_v14 = vmax.f32 %v2309_v62, 0.0 }
 0x2de   : > { %v2285_v11 = vpop.f32.mrf.mxu1 }
 0x2df   : > { %2313 = vst [vmem:[#allocation6] sm:$0xff] %v2311_v14 }
 0x2e1   : > { %v2192_v52 = vld [vmem:[#allocation5 + $0x10] sm:$0x1f] }
 0x2e2   : > { %v2195_v19 = vadd.f32 %v2192_v52, %v4654_v31 }
 0x2e4   : > { %2198 = vst [vmem:[#allocation5 + $0x10] sm:$0x1f] %v2195_v19 }
 0x2e6   : > { %v2315_v25 = vld [vmem:[#allocation6] sm:$0x7]  ;;  %v2561_v40 = vld [vmem:[#allocation6 + $0x3] sm:$0x7] }
 0x2e7   : > { %v2395_v26 = vld [vmem:[#allocation6 + $0x1] sm:$0x7]  ;;  %v2316_v21 = vpack.c.bf16 %v2315_v25, %v2315_v25  ;;  %v2562_v51 = vpack.c.bf16 %v2561_v40, %v2561_v40  ;;  %v2644_v27 = vld [vmem:[#allocation6 + $0x4] sm:$0x7] }
 0x2e8   : > { %v2478_v54 = vld [vmem:[#allocation6 + $0x2] sm:$0x7]  ;;  %v2396_v24 = vpack.c.bf16 %v2395_v26, %v2395_v26  ;;  %v2727_v3 = vld [vmem:[#allocation6 + $0x5] sm:$0x7]  ;;  %v2645_v32 = vpack.c.bf16 %v2644_v27, %v2644_v27 }
 0x2e9   : > { %v2479_v63 = vpack.c.bf16 %v2478_v54, %v2478_v54  ;;  %2389 = vmatmul.bf16.vlgmr.msra.gmra.mxu2 %v2316_v21  ;;  %2636 = vmatmul.bf16.vlgmr.msrb.gmra.mxu1 %v2562_v51  ;;  %v2728_v33 = vpack.c.bf16 %v2727_v3, %v2727_v3 }
 0x2ea   : > { %2470 = vmatmul.bf16.vlgmr.msra.gmra.mxu3 %v2396_v24 }
 0x2eb   : > { %v2289_v0 = vld [vmem:[#allocation5 + $0x10] sm:$0x1f]  ;;  %2553 = vmatmul.bf16.vlgmr.msra.gmra.mxu0 %v2479_v63 }
 0x2ec   : > { %v2292_v31 = vadd.f32 %v2289_v0, %v2283_v17 }
 0x2ee   : > { %2295 = vst [vmem:[#allocation5 + $0x10] sm:$0x1f] %v2292_v31 }
 0x2f5   : > { %v2299_v5 = vld [vmem:[#allocation5 + $0x10] ss:$2 sm:$0x3]  ;;  %v2303_v29 = vld [vmem:[#allocation5 + $0x11] ss:$2 sm:$0x3] }
 0x2f6   : > { %v2305_v30 = vmax.f32 %v2299_v5, %v2303_v29 }
 0x2f8   : > { %v2310_v34 = vadd.f32 %v4171_v10, %v2305_v30 }
 0x2f9   : > { %2719 = vmatmul.bf16.vlgmr.msrb.gmra.mxu2 %v2645_v32 }
 0x2fa   : > { %2802 = vmatmul.bf16.vlgmr.msrb.gmra.mxu3 %v2728_v33  ;;  %v2312_v36 = vmax.f32 %v2310_v34, 0.0 }
 0x2fc   : > { %2314 = vst [vmem:[#allocation6 + $0x8] sm:$0x3] %v2312_v36 }
 0x303   : > { %v2810_v37 = vld [vmem:[#allocation6 + $0x6] sm:$0x7] }
 0x304   : > { %v2893_v28 = vld [vmem:[#allocation6 + $0x7] sm:$0x7]  ;;  %v2811_v60 = vpack.c.bf16 %v2810_v37, %v2810_v37 }
 0x305   : > { %v2894_v39 = vpack.c.bf16 %v2893_v28, %v2893_v28 }
 0x306   : > { %2885 = vmatmul.bf16.vlgmr.msrb.gmra.mxu0 %v2811_v60 }
 0x307   : > { %2968 = vmatmul.bf16.vlgmr.msra.gmra.mxu1 %v2894_v39 }
 0x366   : > { %v2637_v38 = vpop.f32.mrf.mxu1 }
 0x368   : > { %v2554_v6 = vpop.f32.mrf.mxu0 }
 0x36c   : > { %v2390_v55 = vpop.f32.mrf.mxu2 }
 0x36d   : > { %v2471_v41 = vpop.f32.mrf.mxu3  ;;  %2394 = vst [vmem:[#allocation7] sm:$0x7] %v2390_v55 }
 0x36e   : > { %v2639_v44 = vpop.f32.mrf.mxu1 }
 0x370   : > { %v2556_v8 = vpop.f32.mrf.mxu0 }
 0x374   : > { %v2475_v45 = vld [vmem:[#allocation7] sm:$0x7]  ;;  %v2392_v46 = vpop.f32.mrf.mxu2 }
 0x375   : > { %v2473_v13 = vpop.f32.mrf.mxu3  ;;  %v2476_v22 = vadd.f32 %v2475_v45, %v2471_v41 }
 0x377   : > { %2477 = vst [vmem:[#allocation7] sm:$0x7] %v2476_v22 }
 0x37c   : > { %v2720_v47 = vpop.f32.mrf.mxu2 }
 0x37d   : > { %v2803_v49 = vpop.f32.mrf.mxu3 }
 0x37e   : > { %v2558_v50 = vld [vmem:[#allocation7] sm:$0x7] }
 0x37f   : > { %v2559_v53 = vadd.f32 %v2558_v50, %v2554_v6 }
 0x381   : > { %2560 = vst [vmem:[#allocation7] sm:$0x7] %v2559_v53 }
 0x383   : > { %v2886_v56 = vpop.f32.mrf.mxu0 }
 0x384   : > { %v2969_v2 = vpop.f32.mrf.mxu1  ;;  %v2722_v42 = vpop.f32.mrf.mxu2 }
 0x385   : > { %v2805_v4 = vpop.f32.mrf.mxu3 }
 0x388   : > { %v2641_v7 = vld [vmem:[#allocation7] sm:$0x7] }
 0x389   : > { %v2642_v35 = vadd.f32 %v2641_v7, %v2637_v38 }
 0x38b   : > { %v2888_v1 = vpop.f32.mrf.mxu0  ;;  %2643 = vst [vmem:[#allocation7] sm:$0x7] %v2642_v35 }
 0x38c   : > { %v2971_v15 = vpop.f32.mrf.mxu1 }
 0x392   : > { %v2724_v17 = vld [vmem:[#allocation7] sm:$0x7] }
 0x393   : > { %v2725_v58 = vadd.f32 %v2724_v17, %v2720_v47 }
 0x395   : > { %2726 = vst [vmem:[#allocation7] sm:$0x7] %v2725_v58 }
 0x39c   : > { %v2807_v12 = vld [vmem:[#allocation7] sm:$0x7] }
 0x39d   : > { %v2808_v16 = vadd.f32 %v2807_v12, %v2803_v49 }
 0x39f   : > { %2809 = vst [vmem:[#allocation7] sm:$0x7] %v2808_v16 }
 0x3a6   : > { %v2890_v10 = vld [vmem:[#allocation7] sm:$0x7] }
 0x3a7   : > { %v2891_v18 = vadd.f32 %v2890_v10, %v2886_v56 }
 0x3a9   : > { %2892 = vst [vmem:[#allocation7] sm:$0x7] %v2891_v18 }
 0x3b0   : > { %v2973_v48 = vld [vmem:[#allocation7] sm:$0x7] }
 0x3b1   : > { %v2974_v57 = vadd.f32 %v2973_v48, %v2969_v2 }
 0x3b3   : > { %2975 = vst [vmem:[#allocation7] sm:$0x7] %v2974_v57 }
 0x3ba   : > { %v2977_v59 = vld [vmem:[#allocation7] ss:$2 sm:$0x1]  ;;  %v2979_v62 = vld [vmem:[#allocation7 + $0x1] ss:$2 sm:$0x1] }
 0x3bb   : > { %v2980_v14 = vmax.f32 %v2977_v59, %v2979_v62 }
 0x3bd   : > { %v2981_v43 = vadd.f32 %v2980_v14, %v2976_v20 }
 0x3bf   : > { %v2982_v9 = vmax.f32 %v2981_v43, 0.0 }
 0x3c1   : > { %2983 = vst [vmem:[%s320_s16] sm:$0x1] %v2982_v9 }
 0x3c2   : > { %4289 = shalt.err (!%p4286_p8)
}
 0x3c3   : > { %4110 = dma.vmem_to_hbm [thread:$0]  (%p4417_p5), %s2996_s1, 16, %s2998_s19, %s2985_s13  }
 0x3c4 PF: > { %p4132_p9 = scmp.ge.s32.totalorder %s4332_s27, 2  ;;  %s3009_s8 = sand.u32 1, %s4320_s24  }
 0x3c5   : > { %s3010_s14 = scalar_lea.sflag [#allocation10], %s3009_s8 }
 0x3c6   : > { %p4123_p10 = pnand %p4132_p9, %p4421_p6 }
 0x3c8   : > { %p4124_p11 = pneg %p4123_p10 }
 0x3ca   : > { %4315 = dma.done.wait (%p4124_p11), %s3010_s14, 16  }
 0x3cb   : > { %4317 = vsyncadd (%p4124_p11), %s3010_s14, 4294967280  ;;  %p19_p12 = scmp.ge.s32.totalorder %s4404_s30, 4   ;;  %s4717_s24 = smov %s4324_s25 }
 0x3cc   : > { %s4718_s25 = smov %s4328_s26  ;;  %s4719_s26 = smov %s4415_s10 }
 0x3cd   : > { %s4720_s27 = smov %s4404_s30  ;;  %21 = sbr.rel (!%p19_p12) target bundleno = 7 (0x7), region = 129 }
 0x3d2   :  { %3015 = vsyncpa [#allocation9], 1 }
 0x3d3   :  { %3017 = vsyncpa [#allocation9 + $0x1], 1 }
 0x3d4   :  { %3018 = vsyncpa [#allocation12], 1 }
 0x3d5   :  { %3019 = vsyncpa [#allocation10], 1 }
 0x3d6   :  { %3021 = vsyncpa [#allocation10 + $0x1], 1 }

</bundles_post_ra>
